<compile_context>
chip_gen: v7x
topology: tpu7x:2x2x1
jax: 0.10.0
libtpu: 0.0.40
codegen_flags: <defaults>
</compile_context>

<pallas_src>
import functools

import jax
import jax.numpy as jnp
from jax.experimental import pallas as pl
from jax.experimental.pallas import tpu as pltpu

EPS = 1e-5
LANE = 128
# Rows per time tile.  Bounds per-grid-step VMEM (~5 MiB at cp=128) so the kernel fits
# v7x's 64 MiB VMEM; can be raised (together with vmem_limit_bytes) on v5e/v6e (128 MiB).
TIME_TILE_TARGET = 1024


def _round_up(n, m):
    return ((n + m - 1) // m) * m


def _choose_time_tile(l2, target=TIME_TILE_TARGET):
    """Largest multiple-of-8 divisor of l2 that is <= target (or l2 itself)."""
    if l2 <= target:
        return l2
    best = 0
    for cand in range(8, target + 1, 8):
        if l2 % cand == 0:
            best = cand
    return best if best else l2


# ----------------------------- kernel-side helpers -----------------------------


def _causal_taps(hist_ref, h, first_tile):
    """Return (x[t-2], x[t-1]) rows for h using a carried 2-row history scratch.

    hist_ref persists across grid steps; it is zeroed on the first time tile of each
    batch element (== causal left zero padding) and updated to the tile's last 2 rows.
    """
    t = h.shape[0]

    @pl.when(first_tile)
    def _():
        hist_ref[...] = jnp.zeros_like(hist_ref)

    ext = jnp.concatenate([hist_ref[...], h], axis=0)   # (t + 2, C)
    hist_ref[...] = h[t - 2:, :]                        # history for the next tile
    return ext[0:t], ext[1:t + 1]                       # x[t-2], x[t-1]


def _accum_stats(ps_ref, y, first_tile):
    """Accumulate per-channel sum / sum-of-squares across time tiles (resident block)."""

    @pl.when(first_tile)
    def _():
        ps_ref[...] = jnp.zeros_like(ps_ref)

    s = jnp.sum(y, axis=0, keepdims=True)
    ss = jnp.sum(y * y, axis=0, keepdims=True)
    ps_ref[0] += jnp.concatenate([s, ss], axis=0)


def _make_pool_conv1_kernel(pool, c_in):
    """MaxPool1d(pool) -> causal conv1 (3 per-tap matmuls, +bias) -> BN1 partials."""

    def kernel(x_ref, w0_ref, w1_ref, w2_ref, b_ref, y_ref, ps_ref, hist_ref):
        first = pl.program_id(1) == 0
        xw = x_ref[0]                                   # (T, pool * c_in), pool folded into lanes
        if pool > 1:
            xp = xw[:, 0:c_in]
            for k in range(1, pool):
                xp = jnp.maximum(xp, xw[:, k * c_in:(k + 1) * c_in])
        else:
            xp = xw
        m2, m1 = _causal_taps(hist_ref, xp, first)      # x[t-2], x[t-1]
        y = (jnp.dot(m2, w0_ref[...], preferred_element_type=jnp.float32)
             + jnp.dot(m1, w1_ref[...], preferred_element_type=jnp.float32)
             + jnp.dot(xp, w2_ref[...], preferred_element_type=jnp.float32)
             + b_ref[...])
        y_ref[0] = y
        _accum_stats(ps_ref, y, first)

    return kernel


def _bn_relu_conv2_kernel(y1_ref, sc_ref, sh_ref, w_ref, b_ref, y2_ref, ps_ref, hist_ref):
    """Folded BN1 + ReLU + causal conv2 (one fused im2col matmul, +bias) + BN2 partials."""
    first = pl.program_id(1) == 0
    h = jnp.maximum(y1_ref[0] * sc_ref[...] + sh_ref[...], 0.0)
    m2, m1 = _causal_taps(hist_ref, h, first)
    slab = jnp.concatenate([m2, m1, h], axis=-1)        # (T, 3*cp_out), lane-aligned concat
    y = jnp.dot(slab, w_ref[...], preferred_element_type=jnp.float32) + b_ref[...]
    y2_ref[0] = y
    _accum_stats(ps_ref, y, first)


def _bn_relu_kernel(y_ref, sc_ref, sh_ref, o_ref):
    """Final BN2 (folded scale/shift) + ReLU (fold into the next block when composing)."""
    o_ref[0] = jnp.maximum(y_ref[0] * sc_ref[...] + sh_ref[...], 0.0)


# ----------------------------- wrapper-side helpers -----------------------------


def _tap_weights(w, cp_out):
    """Torch Conv1d weight (Cout, Cin, 3) -> three (Cin, cp_out) matrices; tap k pairs with x[t-2+k]."""
    co, ci, k = w.shape
    taps = []
    for kk in range(k):
        wt = jnp.zeros((ci, cp_out), jnp.float32).at[:, :co].set(
            jnp.transpose(w[:, :, kk]).astype(jnp.float32))
        taps.append(wt)
    return taps


def _pack_conv_w(w, ci_pack, co_pack):
    """Torch Conv1d weight (Cout, Cin, 3) -> im2col weight (3*ci_pack, co_pack).

    Row block k*ci_pack:(k+1)*ci_pack holds tap k, which multiplies x[t - 2 + k]."""
    co, ci, k = w.shape
    wp = jnp.zeros((co_pack, ci_pack, k), jnp.float32).at[:co, :ci, :].set(
        w.astype(jnp.float32))
    return jnp.transpose(wp, (2, 1, 0)).reshape(k * ci_pack, co_pack)


def _pad_vec(v, cp):
    return jnp.zeros((cp,), jnp.float32).at[: v.shape[0]].set(v.astype(jnp.float32))


def _bn_scale_shift(pstats, gamma_p, beta_p, count):
    """Fold batch stats (per-batch sum/sumsq) + gamma/beta into a scale/shift pair."""
    tot = jnp.sum(pstats, axis=0)                            # (2, Cp)
    mean = tot[0] / count
    var = jnp.maximum(tot[1] / count - mean * mean, 0.0)     # biased variance (training BN)
    scale = gamma_p * jax.lax.rsqrt(var + EPS)
    shift = beta_p - mean * scale
    return scale.reshape(1, -1), shift.reshape(1, -1)


def _seq_params():
    # Batch axis parallel (megacore sharding), time axis sequential (history carry).
    return pltpu.CompilerParams(
        dimension_semantics=("parallel", "arbitrary"),
        vmem_limit_bytes=64 * 1024 * 1024,
    )


@functools.partial(jax.jit, static_argnames=("pooling", "pool", "time_tile"))
def down_causal_forward(x_ncl, params, pooling=True, pool=2, time_tile=None):
    """Down_causal forward: (N, C_in, L) -> (N, C_out, L // pool)  (L if pooling=False)."""
    n, c_in, l = x_ncl.shape
    c_out = params["w1"].shape[0]
    pool_f = pool if pooling else 1
    assert l % pool_f == 0
    l2 = l // pool_f
    assert l2 >= 2
    cp_out = _round_up(c_out, LANE)
    l_tile = time_tile if time_tile else _choose_time_tile(l2)
    assert l2 % l_tile == 0 and (l_tile == l2 or l_tile % 8 == 0)
    n_t = l2 // l_tile

    # Ingress layout plumbing (once per block; a composed UNet should keep this
    # channels-last layout between blocks and only transpose at model ingress/egress).
    x = jnp.transpose(x_ncl, (0, 2, 1)).astype(jnp.float32)      # (N, L, c_in)
    # Fold the pooling window into the lane dim (free row-major reshape): the kernel
    # takes the max over `pool` static lane slices. No padded-channel HBM inflation.
    x = x.reshape(n, l2, pool_f * c_in)

    wt0, wt1, wt2 = _tap_weights(params["w1"], cp_out)           # (c_in, cp_out) each
    w2p = _pack_conv_w(params["w2"], cp_out, cp_out)             # (3*cp_out, cp_out)
    b1 = _pad_vec(params["b1"], cp_out).reshape(1, cp_out)
    b2 = _pad_vec(params["b2"], cp_out).reshape(1, cp_out)
    g1 = _pad_vec(params["gamma1"], cp_out)
    g2 = _pad_vec(params["gamma2"], cp_out)
    be1 = _pad_vec(params["beta1"], cp_out)
    be2 = _pad_vec(params["beta2"], cp_out)

    x_spec = pl.BlockSpec((1, l_tile, pool_f * c_in), lambda i, t: (i, t, 0))
    y_spec = pl.BlockSpec((1, l_tile, cp_out), lambda i, t: (i, t, 0))
    ps_spec = pl.BlockSpec((1, 2, cp_out), lambda i, t: (i, 0, 0))     # resident accumulator
    wtap_spec = pl.BlockSpec((c_in, cp_out), lambda i, t: (0, 0))
    w2_spec = pl.BlockSpec((3 * cp_out, cp_out), lambda i, t: (0, 0))
    vec_spec = pl.BlockSpec((1, cp_out), lambda i, t: (0, 0))

    y_shape = jax.ShapeDtypeStruct((n, l2, cp_out), jnp.float32)
    ps_shape = jax.ShapeDtypeStruct((n, 2, cp_out), jnp.float32)

    # Pass 1: MaxPool1d + causal conv1 (+bias); per-batch BN1 sum/sumsq accumulated over tiles.
    y1, ps1 = pl.pallas_call(
        _make_pool_conv1_kernel(pool_f, c_in),
        grid=(n, n_t),
        in_specs=[x_spec, wtap_spec, wtap_spec, wtap_spec, vec_spec],
        out_specs=(y_spec, ps_spec),
        out_shape=(y_shape, ps_shape),
        scratch_shapes=[pltpu.VMEM((2, c_in), jnp.float32)],
        compiler_params=_seq_params(),
    )(x, wt0, wt1, wt2, b1)

    sc1, sh1 = _bn_scale_shift(ps1, g1, be1, n * l2)

    # Pass 2: folded BN1 + ReLU + causal conv2 (+bias); BN2 partials.
    y2, ps2 = pl.pallas_call(
        _bn_relu_conv2_kernel,
        grid=(n, n_t),
        in_specs=[y_spec, vec_spec, vec_spec, w2_spec, vec_spec],
        out_specs=(y_spec, ps_spec),
        out_shape=(y_shape, ps_shape),
        scratch_shapes=[pltpu.VMEM((2, cp_out), jnp.float32)],
        compiler_params=_seq_params(),
    )(y1, sc1, sh1, w2p, b2)

    sc2, sh2 = _bn_scale_shift(ps2, g2, be2, n * l2)

    # Pass 3: folded BN2 + ReLU (standalone block only; fuse into the next block's conv
    # when composing the UNet to remove one full HBM read+write of the activation).
    out = pl.pallas_call(
        _bn_relu_kernel,
        grid=(n, n_t),
        in_specs=[y_spec, vec_spec, vec_spec],
        out_specs=y_spec,
        out_shape=y_shape,
        compiler_params=pltpu.CompilerParams(
            dimension_semantics=("parallel", "parallel"),
            vmem_limit_bytes=64 * 1024 * 1024,
        ),
    )(y2, sc2, sh2)

    # Egress: drop channel padding, back to PyTorch NCL layout.
    return jnp.transpose(out[:, :, :c_out], (0, 2, 1))


# ----------------------------- pure-JAX reference -----------------------------


def _ref_conv_bn_relu(h, w, b, g, be):
    """Causal Conv1d(k=3, left pad 2) + BatchNorm1d (training stats) + ReLU, NCL layout."""
    n, c, l = h.shape
    hp = jnp.pad(h, ((0, 0), (0, 0), (2, 0)))
    taps = jnp.stack([hp[:, :, k:k + l] for k in range(3)], axis=-1)   # (N, C, L, 3)
    y = jnp.einsum("nclk,ock->nol", taps, w) + b[None, :, None]
    mean = jnp.mean(y, axis=(0, 2), keepdims=True)
    var = jnp.mean((y - mean) ** 2, axis=(0, 2), keepdims=True)
    yn = (y - mean) * jax.lax.rsqrt(var + EPS) * g[None, :, None] + be[None, :, None]
    return jnp.maximum(yn, 0.0)


def ref_forward(x, params, pooling=True, pool=2):
    if pooling:
        n, c, l = x.shape
        x = jnp.max(x.reshape(n, c, l // pool, pool), axis=-1)
    h = _ref_conv_bn_relu(x, params["w1"], params["b1"], params["gamma1"], params["beta1"])
    return _ref_conv_bn_relu(h, params["w2"], params["b2"], params["gamma2"], params["beta2"])


def init_params(key, in_ch, out_ch):
    """Deterministic init mimicking PyTorch Conv1d defaults (U(+/- 1/sqrt(fan_in)))."""
    k1, k2, k3, k4 = jax.random.split(key, 4)
    bound1 = (in_ch * 3) ** -0.5
    bound2 = (out_ch * 3) ** -0.5
    return {
        "w1": jax.random.uniform(k1, (out_ch, in_ch, 3), jnp.float32, -bound1, bound1),
        "b1": jax.random.uniform(k2, (out_ch,), jnp.float32, -bound1, bound1),
        "gamma1": jnp.ones((out_ch,), jnp.float32),
        "beta1": jnp.zeros((out_ch,), jnp.float32),
        "w2": jax.random.uniform(k3, (out_ch, out_ch, 3), jnp.float32, -bound2, bound2),
        "b2": jax.random.uniform(k4, (out_ch,), jnp.float32, -bound2, bound2),
        "gamma2": jnp.ones((out_ch,), jnp.float32),
        "beta2": jnp.zeros((out_ch,), jnp.float32),
    }


if __name__ == "__main__":
    key = jax.random.PRNGKey(0)
    kx, kp = jax.random.split(key)

    N, C_IN, C_OUT = 2, 4, 8
    params = init_params(kp, C_IN, C_OUT)

    # 1) Down_causal pattern: MaxPool1d(2,2) + causal double conv (down1/down2 of the UNet).
    x = jax.random.normal(kx, (N, C_IN, 16), dtype=jnp.float32)
    out = jax.block_until_ready(down_causal_forward(x, params, pooling=True, pool=2))
    assert out.shape == (N, C_OUT, 8), out.shape
    ref = ref_forward(x, params, pooling=True, pool=2)
    err = float(jnp.max(jnp.abs(out - ref)))
    assert err < 1e-3, err

    # 2) double_conv_causal pattern without pooling (inc / down4 of the UNet, dilation=1).
    out_np = jax.block_until_ready(down_causal_forward(x, params, pooling=False))
    assert out_np.shape == (N, C_OUT, 16), out_np.shape
    ref_np = ref_forward(x, params, pooling=False)
    err_np = float(jnp.max(jnp.abs(out_np - ref_np)))
    assert err_np < 1e-3, err_np

    # 3) Multi-time-tile path: exercises the causal halo carry + cross-tile BN stats.
    x3 = jax.random.normal(jax.random.fold_in(kx, 1), (N, C_IN, 64), dtype=jnp.float32)
    out3 = jax.block_until_ready(
        down_causal_forward(x3, params, pooling=True, pool=2, time_tile=8))
    ref3 = ref_forward(x3, params, pooling=True, pool=2)
    err3 = float(jnp.max(jnp.abs(out3 - ref3)))
    assert err3 < 1e-3, err3

    # 4) pool=5 path (down3 uses pooling_kernel_size=5).
    x4 = jax.random.normal(jax.random.fold_in(kx, 2), (N, C_IN, 40), dtype=jnp.float32)
    out4 = jax.block_until_ready(down_causal_forward(x4, params, pooling=True, pool=5))
    ref4 = ref_forward(x4, params, pooling=True, pool=5)
    err4 = float(jnp.max(jnp.abs(out4 - ref4)))
    assert err4 < 1e-3, err4

    print("KERNEL_OK")
</pallas_src>

<mosaic_0001>
module attributes {stable_mosaic.version = 11 : i64} {
  func.func @kernel(%arg0: i32, %arg1: i32, %arg2: memref<1x8x8xf32, #tpu.memory_space<vmem>>, %arg3: memref<4x128xf32, #tpu.memory_space<vmem>>, %arg4: memref<4x128xf32, #tpu.memory_space<vmem>>, %arg5: memref<4x128xf32, #tpu.memory_space<vmem>>, %arg6: memref<1x128xf32, #tpu.memory_space<vmem>>, %arg7: memref<1x8x128xf32, #tpu.memory_space<vmem>>, %arg8: memref<1x2x128xf32, #tpu.memory_space<vmem>>, %arg9: memref<2x4xf32, #tpu.memory_space<vmem>>) attributes {dimension_semantics = [#tpu.dimension_semantics<parallel>, #tpu.dimension_semantics<arbitrary>], iteration_bounds = array<i64: 2, 1>, scalar_prefetch = 0 : i64, scratch_operands = 1 : i64, tpu.core_type = #tpu.core_type<tc>, window_params = [{transform_indices = @transform_0, window_bounds = array<i64: 1, 8, 8>}, {pipeline_mode = #tpu.pipeline_mode<synchronous>, transform_indices = @transform_1, window_bounds = array<i64: 4, 128>}, {pipeline_mode = #tpu.pipeline_mode<synchronous>, transform_indices = @transform_2, window_bounds = array<i64: 4, 128>}, {pipeline_mode = #tpu.pipeline_mode<synchronous>, transform_indices = @transform_3, window_bounds = array<i64: 4, 128>}, {pipeline_mode = #tpu.pipeline_mode<synchronous>, transform_indices = @transform_4, window_bounds = array<i64: 1, 128>}, {transform_indices = @transform_5, window_bounds = array<i64: 1, 8, 128>}, {transform_indices = @transform_6, window_bounds = array<i64: 1, 2, 128>}]} {
    %c0_i32 = arith.constant 0 : i32
    %0 = arith.cmpi eq, %arg1, %c0_i32 : i32
    %c0 = arith.constant 0 : index
    %c0_0 = arith.constant 0 : index
    %c0_1 = arith.constant 0 : index
    %1 = vector.load %arg2[%c0, %c0_0, %c0_1] : memref<1x8x8xf32, #tpu.memory_space<vmem>>, vector<1x8x8xf32>
    %2 = vector.shape_cast %1 : vector<1x8x8xf32> to vector<8x8xf32>
    %3 = vector.extract_strided_slice %2 {offsets = [0, 0], sizes = [8, 4], strides = [1, 1]} : vector<8x8xf32> to vector<8x4xf32>
    %4 = vector.extract_strided_slice %2 {offsets = [0, 4], sizes = [8, 4], strides = [1, 1]} : vector<8x8xf32> to vector<8x4xf32>
    %5 = arith.maximumf %3, %4 : vector<8x4xf32>
    %6 = arith.extui %0 : i1 to i32
    %c0_i32_2 = arith.constant 0 : i32
    %7 = arith.cmpi ne, %6, %c0_i32_2 : i32
    scf.if %7 {
      %cst_29 = arith.constant 0.000000e+00 : f32
      %42 = vector.broadcast %cst_29 : f32 to vector<2x4xf32>
      %c0_30 = arith.constant 0 : index
      %c0_31 = arith.constant 0 : index
      %43 = vector.load %arg9[%c0_30, %c0_31] : memref<2x4xf32, #tpu.memory_space<vmem>>, vector<2x4xf32>
      tpu.vector_store %arg9[%c0_30, %c0_31], %42 {strides = array<i32>} : memref<2x4xf32, #tpu.memory_space<vmem>>, vector<2x4xf32>,
    } else {
    }
    %c0_3 = arith.constant 0 : index
    %c0_4 = arith.constant 0 : index
    %8 = vector.load %arg9[%c0_3, %c0_4] : memref<2x4xf32, #tpu.memory_space<vmem>>, vector<2x4xf32>
    %9 = tpu.concatenate %8, %5 in 0 : vector<2x4xf32>, vector<8x4xf32> -> vector<10x4xf32>
    %10 = vector.extract_strided_slice %5 {offsets = [6, 0], sizes = [2, 4], strides = [1, 1]} : vector<8x4xf32> to vector<2x4xf32>
    %c0_5 = arith.constant 0 : index
    %c0_6 = arith.constant 0 : index
    %11 = vector.load %arg9[%c0_5, %c0_6] : memref<2x4xf32, #tpu.memory_space<vmem>>, vector<2x4xf32>
    tpu.vector_store %arg9[%c0_5, %c0_6], %10 {strides = array<i32>} : memref<2x4xf32, #tpu.memory_space<vmem>>, vector<2x4xf32>,
    %12 = vector.extract_strided_slice %9 {offsets = [0, 0], sizes = [8, 4], strides = [1, 1]} : vector<10x4xf32> to vector<8x4xf32>
    %13 = vector.extract_strided_slice %9 {offsets = [1, 0], sizes = [8, 4], strides = [1, 1]} : vector<10x4xf32> to vector<8x4xf32>
    %c0_7 = arith.constant 0 : index
    %c0_8 = arith.constant 0 : index
    %14 = vector.load %arg3[%c0_7, %c0_8] : memref<4x128xf32, #tpu.memory_space<vmem>>, vector<4x128xf32>
    %cst = arith.constant dense<0.000000e+00> : vector<8x128xf32>
    %15 = tpu.matmul %12, %14, %cst {dimension_numbers = #tpu.dot_dimension_numbers<[1], [0], [0], [1], [0, 0, 1, 1], [], []>} : vector<8x4xf32>, vector<4x128xf32>, vector<8x128xf32> -> vector<8x128xf32>
    %c0_9 = arith.constant 0 : index
    %c0_10 = arith.constant 0 : index
    %16 = vector.load %arg4[%c0_9, %c0_10] : memref<4x128xf32, #tpu.memory_space<vmem>>, vector<4x128xf32>
    %cst_11 = arith.constant dense<0.000000e+00> : vector<8x128xf32>
    %17 = tpu.matmul %13, %16, %cst_11 {dimension_numbers = #tpu.dot_dimension_numbers<[1], [0], [0], [1], [0, 0, 1, 1], [], []>} : vector<8x4xf32>, vector<4x128xf32>, vector<8x128xf32> -> vector<8x128xf32>
    %18 = arith.addf %15, %17 : vector<8x128xf32>
    %c0_12 = arith.constant 0 : index
    %c0_13 = arith.constant 0 : index
    %19 = vector.load %arg5[%c0_12, %c0_13] : memref<4x128xf32, #tpu.memory_space<vmem>>, vector<4x128xf32>
    %cst_14 = arith.constant dense<0.000000e+00> : vector<8x128xf32>
    %20 = tpu.matmul %5, %19, %cst_14 {dimension_numbers = #tpu.dot_dimension_numbers<[1], [0], [0], [1], [0, 0, 1, 1], [], []>} : vector<8x4xf32>, vector<4x128xf32>, vector<8x128xf32> -> vector<8x128xf32>
    %21 = arith.addf %18, %20 : vector<8x128xf32>
    %c0_15 = arith.constant 0 : index
    %c0_16 = arith.constant 0 : index
    %22 = vector.load %arg6[%c0_15, %c0_16] : memref<1x128xf32, #tpu.memory_space<vmem>>, vector<1x128xf32>
    %23 = vector.broadcast %22 : vector<1x128xf32> to vector<8x128xf32>
    %24 = arith.addf %21, %23 : vector<8x128xf32>
    %c0_17 = arith.constant 0 : index
    %c0_18 = arith.constant 0 : index
    %c0_19 = arith.constant 0 : index
    %25 = vector.load %arg7[%c0_17, %c0_18, %c0_19] : memref<1x8x128xf32, #tpu.memory_space<vmem>>, vector<1x8x128xf32>
    %26 = vector.shape_cast %25 : vector<1x8x128xf32> to vector<8x128xf32>
    %27 = vector.shape_cast %24 : vector<8x128xf32> to vector<1x8x128xf32>
    tpu.vector_store %arg7[%c0_17, %c0_18, %c0_19], %27 {strides = array<i32>} : memref<1x8x128xf32, #tpu.memory_space<vmem>>, vector<1x8x128xf32>,
    %28 = arith.extui %0 : i1 to i32
    %c0_i32_20 = arith.constant 0 : i32
    %29 = arith.cmpi ne, %28, %c0_i32_20 : i32
    scf.if %29 {
      %cst_29 = arith.constant 0.000000e+00 : f32
      %42 = vector.broadcast %cst_29 : f32 to vector<1x2x128xf32>
      %c0_30 = arith.constant 0 : index
      %c0_31 = arith.constant 0 : index
      %c0_32 = arith.constant 0 : index
      %43 = vector.load %arg8[%c0_30, %c0_31, %c0_32] : memref<1x2x128xf32, #tpu.memory_space<vmem>>, vector<1x2x128xf32>
      tpu.vector_store %arg8[%c0_30, %c0_31, %c0_32], %42 {strides = array<i32>} : memref<1x2x128xf32, #tpu.memory_space<vmem>>, vector<1x2x128xf32>,
    } else {
    }
    %cst_21 = arith.constant dense<0.000000e+00> : vector<128xf32>
    %30 = vector.multi_reduction <add>, %24, %cst_21 [0] : vector<8x128xf32> to vector<128xf32>
    %31 = vector.shape_cast %30 : vector<128xf32> to vector<1x128xf32>
    %32 = arith.mulf %24, %24 : vector<8x128xf32>
    %cst_22 = arith.constant dense<0.000000e+00> : vector<128xf32>
    %33 = vector.multi_reduction <add>, %32, %cst_22 [0] : vector<8x128xf32> to vector<128xf32>
    %34 = vector.shape_cast %33 : vector<128xf32> to vector<1x128xf32>
    %c0_23 = arith.constant 0 : index
    %c0_24 = arith.constant 0 : index
    %c0_25 = arith.constant 0 : index
    %35 = vector.load %arg8[%c0_23, %c0_24, %c0_25] : memref<1x2x128xf32, #tpu.memory_space<vmem>>, vector<1x2x128xf32>
    %36 = vector.shape_cast %35 : vector<1x2x128xf32> to vector<2x128xf32>
    %37 = tpu.concatenate %31, %34 in 0 : vector<1x128xf32>, vector<1x128xf32> -> vector<2x128xf32>
    %38 = arith.addf %36, %37 : vector<2x128xf32>
    %c0_26 = arith.constant 0 : index
    %c0_27 = arith.constant 0 : index
    %c0_28 = arith.constant 0 : index
    %39 = vector.load %arg8[%c0_26, %c0_27, %c0_28] : memref<1x2x128xf32, #tpu.memory_space<vmem>>, vector<1x2x128xf32>
    %40 = vector.shape_cast %39 : vector<1x2x128xf32> to vector<2x128xf32>
    %41 = vector.shape_cast %38 : vector<2x128xf32> to vector<1x2x128xf32>
    tpu.vector_store %arg8[%c0_26, %c0_27, %c0_28], %41 {strides = array<i32>} : memref<1x2x128xf32, #tpu.memory_space<vmem>>, vector<1x2x128xf32>,
    return
  }
  func.func @transform_0(%arg0: i32, %arg1: i32) -> (i32, i32, i32) {
    %c0_i32 = arith.constant 0 : i32
    %c0_i32_0 = arith.constant 0 : i32
    return %arg0, %arg1, %c0_i32 : i32, i32, i32
  }
  func.func @transform_1(%arg0: i32, %arg1: i32) -> (i32, i32) {
    %c0_i32 = arith.constant 0 : i32
    %c0_i32_0 = arith.constant 0 : i32
    %c0_i32_1 = arith.constant 0 : i32
    return %c0_i32, %c0_i32_0 : i32, i32
  }
  func.func @transform_2(%arg0: i32, %arg1: i32) -> (i32, i32) {
    %c0_i32 = arith.constant 0 : i32
    %c0_i32_0 = arith.constant 0 : i32
    %c0_i32_1 = arith.constant 0 : i32
    return %c0_i32, %c0_i32_0 : i32, i32
  }
  func.func @transform_3(%arg0: i32, %arg1: i32) -> (i32, i32) {
    %c0_i32 = arith.constant 0 : i32
    %c0_i32_0 = arith.constant 0 : i32
    %c0_i32_1 = arith.constant 0 : i32
    return %c0_i32, %c0_i32_0 : i32, i32
  }
  func.func @transform_4(%arg0: i32, %arg1: i32) -> (i32, i32) {
    %c0_i32 = arith.constant 0 : i32
    %c0_i32_0 = arith.constant 0 : i32
    %c0_i32_1 = arith.constant 0 : i32
    return %c0_i32, %c0_i32_0 : i32, i32
  }
  func.func @transform_5(%arg0: i32, %arg1: i32) -> (i32, i32, i32) {
    %c0_i32 = arith.constant 0 : i32
    %c0_i32_0 = arith.constant 0 : i32
    return %arg0, %arg1, %c0_i32 : i32, i32, i32
  }
  func.func @transform_6(%arg0: i32, %arg1: i32) -> (i32, i32, i32) {
    %c0_i32 = arith.constant 0 : i32
    %c0_i32_0 = arith.constant 0 : i32
    %c0_i32_1 = arith.constant 0 : i32
    return %arg0, %c0_i32, %c0_i32_0 : i32, i32, i32
  }
}

module attributes {stable_mosaic.version = 11 : i64} {
  func.func @_bn_relu_kernel(%arg0: i32, %arg1: i32, %arg2: memref<1x8x128xf32, #tpu.memory_space<vmem>>, %arg3: memref<1x128xf32, #tpu.memory_space<vmem>>, %arg4: memref<1x128xf32, #tpu.memory_space<vmem>>, %arg5: memref<1x8x128xf32, #tpu.memory_space<vmem>>) attributes {dimension_semantics = [#tpu.dimension_semantics<parallel>, #tpu.dimension_semantics<parallel>], iteration_bounds = array<i64: 2, 1>, scalar_prefetch = 0 : i64, scratch_operands = 0 : i64, tpu.core_type = #tpu.core_type<tc>, window_params = [{transform_indices = @transform_0, window_bounds = array<i64: 1, 8, 128>}, {pipeline_mode = #tpu.pipeline_mode<synchronous>, transform_indices = @transform_1, window_bounds = array<i64: 1, 128>}, {pipeline_mode = #tpu.pipeline_mode<synchronous>, transform_indices = @transform_2, window_bounds = array<i64: 1, 128>}, {transform_indices = @transform_3, window_bounds = array<i64: 1, 8, 128>}]} {
    %c0 = arith.constant 0 : index
    %c0_0 = arith.constant 0 : index
    %c0_1 = arith.constant 0 : index
    %0 = vector.load %arg2[%c0, %c0_0, %c0_1] : memref<1x8x128xf32, #tpu.memory_space<vmem>>, vector<1x8x128xf32>
    %1 = vector.shape_cast %0 : vector<1x8x128xf32> to vector<8x128xf32>
    %c0_2 = arith.constant 0 : index
    %c0_3 = arith.constant 0 : index
    %2 = vector.load %arg3[%c0_2, %c0_3] : memref<1x128xf32, #tpu.memory_space<vmem>>, vector<1x128xf32>
    %3 = vector.broadcast %2 : vector<1x128xf32> to vector<8x128xf32>
    %4 = arith.mulf %1, %3 : vector<8x128xf32>
    %c0_4 = arith.constant 0 : index
    %c0_5 = arith.constant 0 : index
    %5 = vector.load %arg4[%c0_4, %c0_5] : memref<1x128xf32, #tpu.memory_space<vmem>>, vector<1x128xf32>
    %6 = vector.broadcast %5 : vector<1x128xf32> to vector<8x128xf32>
    %7 = arith.addf %4, %6 : vector<8x128xf32>
    %cst = arith.constant 0.000000e+00 : f32
    %8 = vector.broadcast %cst : f32 to vector<8x128xf32>
    %9 = arith.maximumf %7, %8 : vector<8x128xf32>
    %c0_6 = arith.constant 0 : index
    %c0_7 = arith.constant 0 : index
    %c0_8 = arith.constant 0 : index
    %10 = vector.load %arg5[%c0_6, %c0_7, %c0_8] : memref<1x8x128xf32, #tpu.memory_space<vmem>>, vector<1x8x128xf32>
    %11 = vector.shape_cast %10 : vector<1x8x128xf32> to vector<8x128xf32>
    %12 = vector.shape_cast %9 : vector<8x128xf32> to vector<1x8x128xf32>
    tpu.vector_store %arg5[%c0_6, %c0_7, %c0_8], %12 {strides = array<i32>} : memref<1x8x128xf32, #tpu.memory_space<vmem>>, vector<1x8x128xf32>,
    return
  }
  func.func @transform_0(%arg0: i32, %arg1: i32) -> (i32, i32, i32) {
    %c0_i32 = arith.constant 0 : i32
    %c0_i32_0 = arith.constant 0 : i32
    return %arg0, %arg1, %c0_i32 : i32, i32, i32
  }
  func.func @transform_1(%arg0: i32, %arg1: i32) -> (i32, i32) {
    %c0_i32 = arith.constant 0 : i32
    %c0_i32_0 = arith.constant 0 : i32
    %c0_i32_1 = arith.constant 0 : i32
    return %c0_i32, %c0_i32_0 : i32, i32
  }
  func.func @transform_2(%arg0: i32, %arg1: i32) -> (i32, i32) {
    %c0_i32 = arith.constant 0 : i32
    %c0_i32_0 = arith.constant 0 : i32
    %c0_i32_1 = arith.constant 0 : i32
    return %c0_i32, %c0_i32_0 : i32, i32
  }
  func.func @transform_3(%arg0: i32, %arg1: i32) -> (i32, i32, i32) {
    %c0_i32 = arith.constant 0 : i32
    %c0_i32_0 = arith.constant 0 : i32
    return %arg0, %arg1, %c0_i32 : i32, i32, i32
  }
}

module attributes {stable_mosaic.version = 11 : i64} {
  func.func @_bn_relu_conv2_kernel(%arg0: i32, %arg1: i32, %arg2: memref<1x8x128xf32, #tpu.memory_space<vmem>>, %arg3: memref<1x128xf32, #tpu.memory_space<vmem>>, %arg4: memref<1x128xf32, #tpu.memory_space<vmem>>, %arg5: memref<384x128xf32, #tpu.memory_space<vmem>>, %arg6: memref<1x128xf32, #tpu.memory_space<vmem>>, %arg7: memref<1x8x128xf32, #tpu.memory_space<vmem>>, %arg8: memref<1x2x128xf32, #tpu.memory_space<vmem>>, %arg9: memref<2x128xf32, #tpu.memory_space<vmem>>) attributes {dimension_semantics = [#tpu.dimension_semantics<parallel>, #tpu.dimension_semantics<arbitrary>], iteration_bounds = array<i64: 2, 1>, scalar_prefetch = 0 : i64, scratch_operands = 1 : i64, tpu.core_type = #tpu.core_type<tc>, window_params = [{transform_indices = @transform_0, window_bounds = array<i64: 1, 8, 128>}, {pipeline_mode = #tpu.pipeline_mode<synchronous>, transform_indices = @transform_1, window_bounds = array<i64: 1, 128>}, {pipeline_mode = #tpu.pipeline_mode<synchronous>, transform_indices = @transform_2, window_bounds = array<i64: 1, 128>}, {pipeline_mode = #tpu.pipeline_mode<synchronous>, transform_indices = @transform_3, window_bounds = array<i64: 384, 128>}, {pipeline_mode = #tpu.pipeline_mode<synchronous>, transform_indices = @transform_4, window_bounds = array<i64: 1, 128>}, {transform_indices = @transform_5, window_bounds = array<i64: 1, 8, 128>}, {transform_indices = @transform_6, window_bounds = array<i64: 1, 2, 128>}]} {
    %c0_i32 = arith.constant 0 : i32
    %0 = arith.cmpi eq, %arg1, %c0_i32 : i32
    %c0 = arith.constant 0 : index
    %c0_0 = arith.constant 0 : index
    %c0_1 = arith.constant 0 : index
    %1 = vector.load %arg2[%c0, %c0_0, %c0_1] : memref<1x8x128xf32, #tpu.memory_space<vmem>>, vector<1x8x128xf32>
    %2 = vector.shape_cast %1 : vector<1x8x128xf32> to vector<8x128xf32>
    %c0_2 = arith.constant 0 : index
    %c0_3 = arith.constant 0 : index
    %3 = vector.load %arg3[%c0_2, %c0_3] : memref<1x128xf32, #tpu.memory_space<vmem>>, vector<1x128xf32>
    %4 = vector.broadcast %3 : vector<1x128xf32> to vector<8x128xf32>
    %5 = arith.mulf %2, %4 : vector<8x128xf32>
    %c0_4 = arith.constant 0 : index
    %c0_5 = arith.constant 0 : index
    %6 = vector.load %arg4[%c0_4, %c0_5] : memref<1x128xf32, #tpu.memory_space<vmem>>, vector<1x128xf32>
    %7 = vector.broadcast %6 : vector<1x128xf32> to vector<8x128xf32>
    %8 = arith.addf %5, %7 : vector<8x128xf32>
    %cst = arith.constant 0.000000e+00 : f32
    %9 = vector.broadcast %cst : f32 to vector<8x128xf32>
    %10 = arith.maximumf %8, %9 : vector<8x128xf32>
    %11 = arith.extui %0 : i1 to i32
    %c0_i32_6 = arith.constant 0 : i32
    %12 = arith.cmpi ne, %11, %c0_i32_6 : i32
    scf.if %12 {
      %cst_28 = arith.constant 0.000000e+00 : f32
      %42 = vector.broadcast %cst_28 : f32 to vector<2x128xf32>
      %c0_29 = arith.constant 0 : index
      %c0_30 = arith.constant 0 : index
      %43 = vector.load %arg9[%c0_29, %c0_30] : memref<2x128xf32, #tpu.memory_space<vmem>>, vector<2x128xf32>
      tpu.vector_store %arg9[%c0_29, %c0_30], %42 {strides = array<i32>} : memref<2x128xf32, #tpu.memory_space<vmem>>, vector<2x128xf32>,
    } else {
    }
    %c0_7 = arith.constant 0 : index
    %c0_8 = arith.constant 0 : index
    %13 = vector.load %arg9[%c0_7, %c0_8] : memref<2x128xf32, #tpu.memory_space<vmem>>, vector<2x128xf32>
    %14 = tpu.concatenate %13, %10 in 0 : vector<2x128xf32>, vector<8x128xf32> -> vector<10x128xf32>
    %15 = vector.extract_strided_slice %10 {offsets = [6, 0], sizes = [2, 128], strides = [1, 1]} : vector<8x128xf32> to vector<2x128xf32>
    %c0_9 = arith.constant 0 : index
    %c0_10 = arith.constant 0 : index
    %16 = vector.load %arg9[%c0_9, %c0_10] : memref<2x128xf32, #tpu.memory_space<vmem>>, vector<2x128xf32>
    tpu.vector_store %arg9[%c0_9, %c0_10], %15 {strides = array<i32>} : memref<2x128xf32, #tpu.memory_space<vmem>>, vector<2x128xf32>,
    %17 = vector.extract_strided_slice %14 {offsets = [0, 0], sizes = [8, 128], strides = [1, 1]} : vector<10x128xf32> to vector<8x128xf32>
    %18 = vector.extract_strided_slice %14 {offsets = [1, 0], sizes = [8, 128], strides = [1, 1]} : vector<10x128xf32> to vector<8x128xf32>
    %19 = tpu.concatenate %17, %18, %10 in 1 : vector<8x128xf32>, vector<8x128xf32>, vector<8x128xf32> -> vector<8x384xf32>
    %c0_11 = arith.constant 0 : index
    %c0_12 = arith.constant 0 : index
    %20 = vector.load %arg5[%c0_11, %c0_12] : memref<384x128xf32, #tpu.memory_space<vmem>>, vector<384x128xf32>
    %cst_13 = arith.constant dense<0.000000e+00> : vector<8x128xf32>
    %21 = tpu.matmul %19, %20, %cst_13 {dimension_numbers = #tpu.dot_dimension_numbers<[1], [0], [0], [1], [0, 0, 1, 1], [], []>} : vector<8x384xf32>, vector<384x128xf32>, vector<8x128xf32> -> vector<8x128xf32>
    %c0_14 = arith.constant 0 : index
    %c0_15 = arith.constant 0 : index
    %22 = vector.load %arg6[%c0_14, %c0_15] : memref<1x128xf32, #tpu.memory_space<vmem>>, vector<1x128xf32>
    %23 = vector.broadcast %22 : vector<1x128xf32> to vector<8x128xf32>
    %24 = arith.addf %21, %23 : vector<8x128xf32>
    %c0_16 = arith.constant 0 : index
    %c0_17 = arith.constant 0 : index
    %c0_18 = arith.constant 0 : index
    %25 = vector.load %arg7[%c0_16, %c0_17, %c0_18] : memref<1x8x128xf32, #tpu.memory_space<vmem>>, vector<1x8x128xf32>
    %26 = vector.shape_cast %25 : vector<1x8x128xf32> to vector<8x128xf32>
    %27 = vector.shape_cast %24 : vector<8x128xf32> to vector<1x8x128xf32>
    tpu.vector_store %arg7[%c0_16, %c0_17, %c0_18], %27 {strides = array<i32>} : memref<1x8x128xf32, #tpu.memory_space<vmem>>, vector<1x8x128xf32>,
    %28 = arith.extui %0 : i1 to i32
    %c0_i32_19 = arith.constant 0 : i32
    %29 = arith.cmpi ne, %28, %c0_i32_19 : i32
    scf.if %29 {
      %cst_28 = arith.constant 0.000000e+00 : f32
      %42 = vector.broadcast %cst_28 : f32 to vector<1x2x128xf32>
      %c0_29 = arith.constant 0 : index
      %c0_30 = arith.constant 0 : index
      %c0_31 = arith.constant 0 : index
      %43 = vector.load %arg8[%c0_29, %c0_30, %c0_31] : memref<1x2x128xf32, #tpu.memory_space<vmem>>, vector<1x2x128xf32>
      tpu.vector_store %arg8[%c0_29, %c0_30, %c0_31], %42 {strides = array<i32>} : memref<1x2x128xf32, #tpu.memory_space<vmem>>, vector<1x2x128xf32>,
    } else {
    }
    %cst_20 = arith.constant dense<0.000000e+00> : vector<128xf32>
    %30 = vector.multi_reduction <add>, %24, %cst_20 [0] : vector<8x128xf32> to vector<128xf32>
    %31 = vector.shape_cast %30 : vector<128xf32> to vector<1x128xf32>
    %32 = arith.mulf %24, %24 : vector<8x128xf32>
    %cst_21 = arith.constant dense<0.000000e+00> : vector<128xf32>
    %33 = vector.multi_reduction <add>, %32, %cst_21 [0] : vector<8x128xf32> to vector<128xf32>
    %34 = vector.shape_cast %33 : vector<128xf32> to vector<1x128xf32>
    %c0_22 = arith.constant 0 : index
    %c0_23 = arith.constant 0 : index
    %c0_24 = arith.constant 0 : index
    %35 = vector.load %arg8[%c0_22, %c0_23, %c0_24] : memref<1x2x128xf32, #tpu.memory_space<vmem>>, vector<1x2x128xf32>
    %36 = vector.shape_cast %35 : vector<1x2x128xf32> to vector<2x128xf32>
    %37 = tpu.concatenate %31, %34 in 0 : vector<1x128xf32>, vector<1x128xf32> -> vector<2x128xf32>
    %38 = arith.addf %36, %37 : vector<2x128xf32>
    %c0_25 = arith.constant 0 : index
    %c0_26 = arith.constant 0 : index
    %c0_27 = arith.constant 0 : index
    %39 = vector.load %arg8[%c0_25, %c0_26, %c0_27] : memref<1x2x128xf32, #tpu.memory_space<vmem>>, vector<1x2x128xf32>
    %40 = vector.shape_cast %39 : vector<1x2x128xf32> to vector<2x128xf32>
    %41 = vector.shape_cast %38 : vector<2x128xf32> to vector<1x2x128xf32>
    tpu.vector_store %arg8[%c0_25, %c0_26, %c0_27], %41 {strides = array<i32>} : memref<1x2x128xf32, #tpu.memory_space<vmem>>, vector<1x2x128xf32>,
    return
  }
  func.func @transform_0(%arg0: i32, %arg1: i32) -> (i32, i32, i32) {
    %c0_i32 = arith.constant 0 : i32
    %c0_i32_0 = arith.constant 0 : i32
    return %arg0, %arg1, %c0_i32 : i32, i32, i32
  }
  func.func @transform_1(%arg0: i32, %arg1: i32) -> (i32, i32) {
    %c0_i32 = arith.constant 0 : i32
    %c0_i32_0 = arith.constant 0 : i32
    %c0_i32_1 = arith.constant 0 : i32
    return %c0_i32, %c0_i32_0 : i32, i32
  }
  func.func @transform_2(%arg0: i32, %arg1: i32) -> (i32, i32) {
    %c0_i32 = arith.constant 0 : i32
    %c0_i32_0 = arith.constant 0 : i32
    %c0_i32_1 = arith.constant 0 : i32
    return %c0_i32, %c0_i32_0 : i32, i32
  }
  func.func @transform_3(%arg0: i32, %arg1: i32) -> (i32, i32) {
    %c0_i32 = arith.constant 0 : i32
    %c0_i32_0 = arith.constant 0 : i32
    %c0_i32_1 = arith.constant 0 : i32
    return %c0_i32, %c0_i32_0 : i32, i32
  }
  func.func @transform_4(%arg0: i32, %arg1: i32) -> (i32, i32) {
    %c0_i32 = arith.constant 0 : i32
    %c0_i32_0 = arith.constant 0 : i32
    %c0_i32_1 = arith.constant 0 : i32
    return %c0_i32, %c0_i32_0 : i32, i32
  }
  func.func @transform_5(%arg0: i32, %arg1: i32) -> (i32, i32, i32) {
    %c0_i32 = arith.constant 0 : i32
    %c0_i32_0 = arith.constant 0 : i32
    return %arg0, %arg1, %c0_i32 : i32, i32, i32
  }
  func.func @transform_6(%arg0: i32, %arg1: i32) -> (i32, i32, i32) {
    %c0_i32 = arith.constant 0 : i32
    %c0_i32_0 = arith.constant 0 : i32
    %c0_i32_1 = arith.constant 0 : i32
    return %arg0, %c0_i32, %c0_i32_0 : i32, i32, i32
  }
}

</mosaic_0001>

<bundles_post_ra>
// kernel: down_causal_forward.5
= control target key start
LH: loop header
LB: loop body
LE: loop exit
PB: predicated region body
PF: predicated region fallthrough
CT: control target
= control target key end

     0   :  { %8 = vsyncpa [#allocation3], 0  ;;  %s905_s0 = inlined_call_operand.hbm [shape: f32[2,8,128], index: 0, kind: input, shape index: {}]   ;;  %s906_s1 = inlined_call_operand.hbm [shape: f32[1,128], index: 1, kind: input, shape index: {}]   ;;  %s907_s2 = inlined_call_operand.hbm [shape: f32[1,128], index: 2, kind: input, shape index: {}]   ;;  %s908_s3 = inlined_call_operand.hbm [shape: f32[2,8,128], index: 3, kind: output, shape index: {}]  }
   0x1   :  { %10 = vsyncpa [#allocation3 + $0x1], 0 }
   0x2   :  { %11 = vsyncpa [#allocation6], 0 }
   0x3   :  { %12 = vsyncpa [#allocation4], 0 }
   0x4   :  { %14 = vsyncpa [#allocation4 + $0x1], 0  ;;  %s661_s12 = smov 0   ;;  %s663_s13 = smov 0  }
   0x5   :  { %s665_s14 = smov 0   ;;  %s667_s15 = smov 0  }
   0x6   :  { %s669_s16 = smov 0   ;;  %s671_s17 = smov 0  }
   0x7 LB: > { %s361_s18 = sadd.s32 4294967295, %s635_s17   ;;  %s362_s19 = sadd.s32 4294967294, %s635_s17   ;;  %s635_s17 = sphi %s671_s17, %s20_s17   ;;  %s631_s16 = sphi %s669_s16, %s931_s16   ;;  %s627_s15 = sphi %s667_s15, %s930_s15   ;;  %s623_s14 = sphi %s665_s14, %s929_s14   ;;  %s619_s13 = sphi %s663_s13, %s928_s13   ;;  %s615_s12 = sphi %s661_s12, %s927_s12  }
   0x8   : > { %p54_p0 = scmp.ne.s32.totalorder %s619_s13, %s615_s12  ;;  %p695_p1 = scmp.eq.s32.totalorder %s361_s18, 0 }
   0x9   : > { %p699_p2 = scmp.eq.s32.totalorder %s361_s18, 1  ;;  %p128_p3 = scmp.eq.s32.totalorder %s362_s19, 1 }
   0xa   : > { %s913_s20 = scalar_select %p695_p1, 1, 0 }
   0xb   : > { %s914_s21 = scalar_select %p699_p2, 1, 0 }
   0xc   : > { %p705_p4 = por %p695_p1, %p54_p0  ;;  %p363_p5 = scmp.ge.s32.totalorder %s635_s17, 1 }
   0xd   : > { %p710_p6 = por %p128_p3, %p54_p0  ;;  %p135_p7 = scmp.lt.s32.totalorder %s635_s17, 3 }
   0xe   : > { %s915_s22 = scalar_select %p705_p4, 1, 0 }
   0xf   : > { %s916_s23 = scalar_select %p710_p6, 1, 0 }
  0x10   : > { %p715_p8 = pnand %p363_p5, %p135_p7  ;;  %s637_s25 = smov [#allocation5]  }
  0x11   : > { %s148_s26 = sshll.u32 %s637_s25, 4  ;;  %s638_s27 = smov [#allocation7]   ;;  %s149_s26 = int_to_ptr.vmem [resolvable:$true] %s148_s26 }
  0x12   : > { %s917_s24 = scalar_select %p715_p8, 1, 0 }
  0x13   : > { %p392_p10 = pneg %p715_p8  ;;  %s159_s28 = sshll.u32 %s638_s27, 4  ;;  %s728_s28 = int_to_ptr.vmem [resolvable:$true] %s159_s28 }
  0x14   : > { %s463_s5 = scalar_lea.hbm %s906_s1, 16 }
  0x15   : > { %p724_p11 = pnand %p392_p10, %p695_p1  ;;  %p464_p12 = scmp.ne.s32.totalorder %s906_s1, %s463_s5 }
  0x16   : > { %p470_p5 = scmp.lt.u32.totalorder %s463_s5, %s906_s1 }
  0x17   : > { %p465_p13 = pneg %p724_p11 }
  0x19   : > { %p466_p0 = pnand %p465_p13, %p464_p12 }
  0x1b   : > { %p467_p3 = pneg %p466_p0 }
  0x1d   : > { %p472_p7 = pnand %p470_p5, %p467_p3 }
  0x1f   : > { %475 = shalt.err (!%p472_p7)
}
  0x20   : > { %s476_s10 = scalar_lea.vmem %s149_s26, 16  ;;  %s483_s11 = scalar_lea.vmem %s149_s26, 32 }
  0x21   : > { %p477_p10 = scmp.ne.s32.totalorder %s149_s26, %s476_s10  ;;  %p484_p1 = scmp.lt.s32.totalorder %s149_s26, %s149_s26 }
  0x22   : > { %p485_p4 = scmp.lt.s32.totalorder %s483_s11, %s476_s10 }
  0x23   : > { %p479_p9 = pnand %p477_p10, %p465_p13 }
  0x24   : > { %p486_p8 = por %p485_p4, %p484_p1 }
  0x25   : > { %p480_p6 = pneg %p479_p9 }
  0x27   : > { %p487_p2 = pnand %p486_p8, %p480_p6 }
  0x29   : > { %490 = shalt.err (!%p487_p2)
}
  0x2a   : > { %395 = dma.hbm_to_vmem [thread:$0]  (!%p724_p11), %s906_s1, 16, %s149_s26, [#allocation6]  }
  0x2b   : > { %s491_s30 = scalar_lea.hbm %s907_s2, 16 }
  0x2c   : > { %p492_p9 = scmp.ne.s32.totalorder %s907_s2, %s491_s30  ;;  %p498_p2 = scmp.lt.u32.totalorder %s491_s30, %s907_s2 }
  0x2e   : > { %p494_p1 = pnand %p492_p9, %p465_p13 }
  0x30   : > { %p495_p4 = pneg %p494_p1 }
  0x32   : > { %p500_p6 = pnand %p498_p2, %p495_p4 }
  0x34   : > { %503 = shalt.err (!%p500_p6)
}
  0x35   : > { %s504_s26 = scalar_lea.vmem %s728_s28, 16  ;;  %s511_s8 = scalar_lea.vmem %s728_s28, 32 }
  0x36   : > { %p505_p8 = scmp.ne.s32.totalorder %s728_s28, %s504_s26  ;;  %p512_p3 = scmp.lt.s32.totalorder %s728_s28, %s728_s28 }
  0x37   : > { %p513_p5 = scmp.lt.s32.totalorder %s511_s8, %s504_s26 }
  0x38   : > { %p507_p12 = pnand %p505_p8, %p465_p13 }
  0x39   : > { %p514_p7 = por %p513_p5, %p512_p3 }
  0x3a   : > { %p508_p0 = pneg %p507_p12 }
  0x3c   : > { %p515_p10 = pnand %p514_p7, %p508_p0 }
  0x3e   : > { %518 = shalt.err (!%p515_p10)
}
  0x3f   : > { %398 = dma.hbm_to_vmem [thread:$0]  (!%p724_p11), %s907_s2, 16, %s728_s28, [#allocation6]  }
  0x40   : > { %s32_s11 = sadd.s32 1, %s631_s16  ;;  %s41_s18 = sadd.s32 1, %s623_s14 }
  0x41   : > { %p34_p13 = scmp.ge.s32.totalorder %s32_s11, 2  ;;  %p48_p9 = scmp.ne.s32.totalorder %s623_s14, %s619_s13 }
  0x42   : > { %p49_p1 = scmp.eq.s32.totalorder %s635_s17, 0  ;;  %p409_p4 = scmp.lt.s32.totalorder %s635_s17, 2 }
  0x43   : > { %s933_s11 = smov (%p34_p13, %s32_s11), 0  ;;  %p919_p6 = scmp.ne.s32.totalorder %s914_s21, 0 }
  0x44   : > { %p50_p2 = por %p49_p1, %p48_p9  ;;  %s36_s19 = ssub.s32 %s631_s16, %s933_s11 }
  0x45   : > { %p788_p8 = por %p919_p6, %p48_p9  ;;  %s170_s25 = sand.u32 1, %s623_s14  }
  0x46   : > { %p39_p12 = scmp.eq.s32.totalorder %s36_s19, 0  ;;  %s367_s28 = sshll.u32 %s170_s25, 3 }
  0x47   : > { %s368_s27 = sshll.u32 %s631_s16, 7  ;;  %s174_s21 = scalar_lea.vmem [#allocation2], %s367_s28 }
  0x48   : > { %s797_s30 = scalar_select %p39_p12, %s623_s14, %s41_s18  }
  0x49   : > { %s802_s6 = scalar_lea.hbm %s905_s0, %s368_s27  ;;  %s182_s7 = sshll.u32 %s174_s21, 4  ;;  %s810_s7 = int_to_ptr.vmem [resolvable:$true] %s182_s7 }
  0x4a   : > { %p806_p11 = pnand %p409_p4, %p50_p2  ;;  %s171_s8 = scalar_lea.sflag [#allocation3], %s170_s25 }
  0x4b   : > { %s519_s9 = scalar_lea.hbm %s802_s6, 128  ;;  %s524_s19 = scalar_lea.hbm %s905_s0, 256 }
  0x4c   : > { %p520_p0 = scmp.ne.s32.totalorder %s802_s6, %s519_s9  ;;  %p521_p3 = pneg %p806_p11 }
  0x4d   : > { %p525_p10 = scmp.lt.u32.totalorder %s802_s6, %s905_s0  ;;  %p526_p13 = scmp.lt.u32.totalorder %s524_s19, %s519_s9 }
  0x4e   : > { %p522_p5 = pnand %p521_p3, %p520_p0  ;;  %p528_p1 = scmp.lt.u32.totalorder %s519_s9, %s802_s6 }
  0x4f   : > { %p527_p9 = por %p526_p13, %p525_p10 }
  0x50   : > { %p523_p7 = pneg %p522_p5 }
  0x51   : > { %p529_p4 = por %p528_p1, %p527_p9 }
  0x53   : > { %p530_p2 = pnand %p529_p4, %p523_p7 }
  0x55   : > { %533 = shalt.err (!%p530_p2)
}
  0x56   : > { %s534_s25 = scalar_lea.vmem %s810_s7, 128  ;;  %s639_s4 = smov [#allocation2]  }
  0x57   : > { %p535_p6 = scmp.ne.s32.totalorder %s810_s7, %s534_s25  ;;  %s539_s5 = sshll.u32 %s639_s4, 4  ;;  %s540_s5 = int_to_ptr.vmem [resolvable:$false] %s539_s5 }
  0x58   : > { %s541_s21 = scalar_lea.vmem %s540_s5, 256  ;;  %p542_p5 = scmp.lt.s32.totalorder %s810_s7, %s540_s5 }
  0x59   : > { %p537_p12 = pnand %p535_p6, %p521_p3  ;;  %p543_p10 = scmp.lt.s32.totalorder %s541_s21, %s534_s25 }
  0x5b   : > { %p538_p0 = pneg %p537_p12  ;;  %p544_p13 = por %p543_p10, %p542_p5 }
  0x5d   : > { %p545_p9 = pnand %p544_p13, %p538_p0 }
  0x5f   : > { %548 = shalt.err (!%p545_p9)
}
  0x60   : > { %402 = dma.hbm_to_vmem [thread:$0]  (!%p806_p11), %s802_s6, 128, %s810_s7, %s171_s8  }
  0x61   : > { %p922_p7 = scmp.ne.s32.totalorder %s917_s24, 0 }
  0x62   : > { %s840_s9 = sand.u32 (!%p922_p7), 1, %s619_s13   ;;  %p923_p3 = scmp.ne.s32.totalorder (!%p922_p7), %s915_s22, 0 }
  0x63   : > { %191 = sbr.rel (%p922_p7) target bundleno = 135 (0x87), region = 32  ;;  %s370_s10 = sshll.u32 (!%p922_p7), %s840_s9, 3 }
  0x64   : > { %s194_s18 = scalar_lea.sflag (!%p922_p7), [#allocation3], %s840_s9  ;;  %s197_s19 = scalar_lea.vmem (!%p922_p7), [#allocation2], %s370_s10 }
  0x6a   : > { %602 = dma.done.wait (%p923_p3), %s194_s18, 128  }
  0x6b   : > { %604 = vsyncadd (%p923_p3), %s194_s18, 4294967168  ;;  %p924_p1 = scmp.ne.s32.totalorder %s913_s20, 0 }
  0x6d   : > { %606 = dma.done.wait (%p924_p1), [#allocation6], 32  }
  0x6e   : > { %608 = vsyncadd (%p924_p1), [#allocation6], 4294967264  ;;  %v228_v0 = vld [vmem:[%s197_s19] sm:$0xff]  ;;  %v374_v1 = vld [vmem:[#allocation5] ss:$0 sm:$0xff]  ;;  %s227_s24 = scalar_lea.vmem [#allocation8], %s370_s10 }
  0x6f   : > { %v375_v2 = vld [vmem:[#allocation7] ss:$0 sm:$0xff]  ;;  %v236_v3 = vmul.f32 %v374_v1, %v228_v0  ;;  %s262_s6 = sshll.u32 %s227_s24, 4  ;;  %s377_s7 = sshll.u32 %s627_s15, 7  ;;  %s853_s6 = int_to_ptr.vmem [resolvable:$true] %s262_s6 }
  0x70   : > { %s858_s20 = scalar_lea.hbm %s908_s3, %s377_s7  ;;  %s248_s8 = scalar_lea.sflag [#allocation4], %s840_s9 }
  0x71   : > { %v244_v4 = vadd.f32 %v375_v2, %v236_v3  ;;  %s549_s28 = scalar_lea.vmem %s853_s6, 128  ;;  %s640_s15 = smov [#allocation8]  }
  0x72   : > { %p550_p11 = scmp.ne.s32.totalorder %s853_s6, %s549_s28  ;;  %s553_s27 = sshll.u32 %s640_s15, 4  ;;  %s554_s27 = int_to_ptr.vmem [resolvable:$false] %s553_s27 }
  0x73   : > { %v245_v5 = vmax.f32 %v244_v4, 0.0  ;;  %s555_s25 = scalar_lea.vmem %s554_s27, 256  ;;  %p556_p6 = scmp.lt.s32.totalorder %s853_s6, %s554_s27 }
  0x74   : > { %p551_p4 = pnand %p550_p11, %p788_p8  ;;  %p557_p12 = scmp.lt.s32.totalorder %s555_s25, %s549_s28 }
  0x75   : > { %246 = vst [vmem:[%s227_s24] sm:$0xff] %v245_v5 }
  0x76   : > { %p552_p2 = pneg %p551_p4  ;;  %p558_p0 = por %p557_p12, %p556_p6 }
  0x78   : > { %p559_p5 = pnand %p558_p0, %p552_p2 }
  0x7a   : > { %562 = shalt.err (!%p559_p5)
}
  0x7b   : > { %s563_s4 = scalar_lea.hbm %s858_s20, 128  ;;  %s567_s9 = scalar_lea.hbm %s908_s3, 256 }
  0x7c   : > { %p564_p10 = scmp.ne.s32.totalorder %s858_s20, %s563_s4  ;;  %p568_p7 = scmp.lt.u32.totalorder %s858_s20, %s908_s3 }
  0x7d   : > { %p569_p3 = scmp.lt.u32.totalorder %s567_s9, %s563_s4  ;;  %p571_p11 = scmp.lt.u32.totalorder %s563_s4, %s858_s20 }
  0x7e   : > { %p565_p13 = pnand %p564_p10, %p788_p8 }
  0x7f   : > { %p570_p1 = por %p569_p3, %p568_p7 }
  0x80   : > { %p566_p9 = pneg %p565_p13 }
  0x81   : > { %p572_p4 = por %p571_p11, %p570_p1 }
  0x83   : > { %p573_p2 = pnand %p572_p4, %p566_p9 }
  0x85   : > { %576 = shalt.err (!%p573_p2)
}
  0x86   : > { %390 = dma.vmem_to_hbm [thread:$0]  (%p788_p8), %s853_s6, 128, %s858_s20, %s248_s8  }
  0x87 PF: > { %s274_s19 = sand.u32 1, %s615_s12   ;;  %p925_p6 = scmp.ne.s32.totalorder %s916_s23, 0 }
  0x88   : > { %p926_p12 = scmp.ge.s32.totalorder %s635_s17, 2  ;;  %s275_s24 = scalar_lea.sflag [#allocation4], %s274_s19 }
  0x8a   : > { %p404_p0 = pnand %p926_p12, %p925_p6 }
  0x8c   : > { %610 = dma.done.wait (!%p404_p0), %s275_s24, 128  }
  0x8d   : > { %612 = vsyncadd (!%p404_p0), %s275_s24, 4294967168  ;;  %s20_s17 = sadd.s32 1, %s635_s17   ;;  %s927_s12 = smov %s619_s13 }
  0x8e   : > { %p17_p5 = scmp.ge.s32.totalorder %s20_s17, 4   ;;  %s928_s13 = smov %s623_s14 }
  0x8f   : > { %s929_s14 = smov %s797_s30  ;;  %s930_s15 = smov %s631_s16 }
  0x90   : > { %s931_s16 = smov %s933_s11  ;;  %19 = sbr.rel (!%p17_p5) target bundleno = 7 (0x7), region = 85 }
  0x97   :  { %280 = vsyncpa [#allocation3], 1 }
  0x98   :  { %282 = vsyncpa [#allocation3 + $0x1], 1 }
  0x99   :  { %283 = vsyncpa [#allocation6], 1 }
  0x9a   :  { %284 = vsyncpa [#allocation4], 1 }
  0x9b   :  { %286 = vsyncpa [#allocation4 + $0x1], 1 }

// kernel: down_causal_forward.3
= control target key start
LH: loop header
LB: loop body
LE: loop exit
PB: predicated region body
PF: predicated region fallthrough
CT: control target
= control target key end

     0   :  { %s1628_s0 = inlined_call_operand.hbm [shape: f32[2,8,8], index: 0, kind: input, shape index: {}]   ;;  %s1629_s1 = inlined_call_operand.hbm [shape: f32[4,128], index: 1, kind: input, shape index: {}]   ;;  %s1630_s2 = inlined_call_operand.hbm [shape: f32[4,128], index: 2, kind: input, shape index: {}]   ;;  %s1631_s3 = inlined_call_operand.hbm [shape: f32[4,128], index: 3, kind: input, shape index: {}]   ;;  %s1632_s4 = inlined_call_operand.hbm [shape: f32[1,128], index: 4, kind: input, shape index: {}]   ;;  %s1633_s5 = inlined_call_operand.hbm [shape: f32[2,8,128], index: 5, kind: output, shape index: {0}]   ;;  %s1634_s6 = inlined_call_operand.hbm [shape: f32[2,2,128], index: 6, kind: output, shape index: {1}]  }
   0x1   :  { %1639 = sst [smem:[#allocation20_spill]] %s1629_s1 }
   0x2   :  { %12 = vsyncpa [#allocation4], 0 }
   0x3   :  { %14 = vsyncpa [#allocation4 + $0x1], 0 }
   0x4   :  { %15 = vsyncpa [#allocation7], 0 }
   0x5   :  { %16 = vsyncpa [#allocation10], 0 }
   0x6   :  { %17 = vsyncpa [#allocation5], 0 }
   0x7   :  { %19 = vsyncpa [#allocation5 + $0x1], 0 }
   0x8   :  { %20 = vsyncpa [#allocation14], 0 }
   0x9   :  { %22 = vsyncpa [#allocation14 + $0x1], 0  ;;  %s1289_s21 = smov 0   ;;  %s1291_s22 = smov 0  }
   0xa   :  { %s1293_s23 = smov 0   ;;  %s1295_s24 = smov 0  }
   0xb   :  { %s1297_s25 = smov 0   ;;  %s1299_s26 = smov 0  }
   0xc LB: > { %s815_s27 = sadd.s32 4294967295, %s1242_s26   ;;  %p817_p0 = scmp.ge.s32.totalorder %s1242_s26, 1  ;;  %s1242_s26 = sphi %s1299_s26, %s28_s26   ;;  %s1238_s25 = sphi %s1297_s25, %s1660_s25   ;;  %s1234_s24 = sphi %s1295_s24, %s1659_s24   ;;  %s1230_s23 = sphi %s1293_s23, %s1658_s23   ;;  %s1226_s22 = sphi %s1291_s22, %s1657_s22   ;;  %s1222_s21 = sphi %s1289_s21, %s1656_s21  }
   0xd   : > { %p1323_p1 = scmp.eq.s32.totalorder %s815_s27, 0  ;;  %p211_p2 = scmp.lt.s32.totalorder %s1242_s26, 3 }
   0xe   : > { %s1244_s30 = smov [#allocation6]   ;;  %s1245_s8 = smov [#allocation9]  }
   0xf   : > { %s1640_s28 = scalar_select %p1323_p1, 1, 0 }
  0x10   : > { %p1328_p3 = pnand %p817_p0, %p211_p2  ;;  %s224_s7 = sshll.u32 %s1244_s30, 4  ;;  %s225_s7 = int_to_ptr.vmem [resolvable:$true] %s224_s7 }
  0x11   : > { %s246_s9 = sshll.u32 %s1245_s8, 4  ;;  %s1246_s11 = smov [#allocation8]   ;;  %s1341_s9 = int_to_ptr.vmem [resolvable:$true] %s246_s9 }
  0x12   : > { %s1641_s29 = scalar_select %p1328_p3, 1, 0 }
  0x13   : > { %p889_p5 = pneg %p1328_p3  ;;  %s235_s12 = sshll.u32 %s1246_s11, 4  ;;  %s1343_s12 = int_to_ptr.vmem [resolvable:$true] %s235_s12 }
  0x14   : > { %s1643_s1 = sld [smem:[#allocation20_spill]] }
  0x15   : > { %p1337_p6 = pnand %p889_p5, %p1323_p1 }
  0x17   : > { %p1353_p8 = pneg %p1337_p6 }
  0x1a   : > { %s978_s15 = scalar_lea.hbm %s1643_s1, 64 }
  0x1b   : > { %p979_p7 = scmp.ne.s32.totalorder %s1643_s1, %s978_s15  ;;  %p985_p11 = scmp.lt.u32.totalorder %s978_s15, %s1643_s1 }
  0x1d   : > { %p981_p9 = pnand %p1353_p8, %p979_p7 }
  0x1f   : > { %p982_p10 = pneg %p981_p9 }
  0x21   : > { %p987_p12 = pnand %p985_p11, %p982_p10 }
  0x23   : > { %990 = shalt.err (!%p987_p12)
}
  0x24   : > { %s991_s30 = scalar_lea.vmem %s225_s7, 64  ;;  %p999_p5 = scmp.lt.s32.totalorder %s225_s7, %s225_s7 }
  0x25   : > { %p992_p13 = scmp.ne.s32.totalorder %s225_s7, %s991_s30  ;;  %p1000_p4 = scmp.lt.s32.totalorder %s991_s30, %s991_s30 }
  0x27   : > { %p994_p0 = pnand %p992_p13, %p1353_p8  ;;  %p1001_p3 = por %p1000_p4, %p999_p5 }
  0x29   : > { %p995_p2 = pneg %p994_p0 }
  0x2b   : > { %p1002_p1 = pnand %p1001_p3, %p995_p2 }
  0x2d   : > { %1005 = shalt.err (!%p1002_p1)
}
  0x2e   : > { %892 = dma.hbm_to_vmem [thread:$0]  (!%p1337_p6), %s1643_s1, 64, %s225_s7, [#allocation7]  }
  0x2f   : > { %s1006_s15 = scalar_lea.hbm %s1631_s3, 64 }
  0x30   : > { %p1007_p7 = scmp.ne.s32.totalorder %s1631_s3, %s1006_s15  ;;  %p1013_p1 = scmp.lt.u32.totalorder %s1006_s15, %s1631_s3 }
  0x32   : > { %p1009_p9 = pnand %p1007_p7, %p1353_p8 }
  0x34   : > { %p1010_p4 = pneg %p1009_p9 }
  0x36   : > { %p1015_p3 = pnand %p1013_p1, %p1010_p4 }
  0x38   : > { %1018 = shalt.err (!%p1015_p3)
}
  0x39   : > { %s1019_s7 = scalar_lea.vmem %s1341_s9, 64  ;;  %p1027_p13 = scmp.lt.s32.totalorder %s1341_s9, %s1341_s9 }
  0x3a   : > { %p1020_p10 = scmp.ne.s32.totalorder %s1341_s9, %s1019_s7  ;;  %p1028_p0 = scmp.lt.s32.totalorder %s1019_s7, %s1019_s7 }
  0x3c   : > { %p1022_p11 = pnand %p1020_p10, %p1353_p8  ;;  %p1029_p2 = por %p1028_p0, %p1027_p13 }
  0x3e   : > { %p1023_p12 = pneg %p1022_p11 }
  0x40   : > { %p1030_p5 = pnand %p1029_p2, %p1023_p12 }
  0x42   : > { %1033 = shalt.err (!%p1030_p5)
}
  0x43   : > { %898 = dma.hbm_to_vmem [thread:$0]  (!%p1337_p6), %s1631_s3, 64, %s1341_s9, [#allocation10]  }
  0x44   : > { %s1034_s14 = scalar_lea.hbm %s1630_s2, 64 }
  0x45   : > { %p1035_p7 = scmp.ne.s32.totalorder %s1630_s2, %s1034_s14  ;;  %p1041_p1 = scmp.lt.u32.totalorder %s1034_s14, %s1630_s2 }
  0x47   : > { %p1037_p9 = pnand %p1035_p7, %p1353_p8 }
  0x49   : > { %p1038_p4 = pneg %p1037_p9 }
  0x4b   : > { %p1043_p3 = pnand %p1041_p1, %p1038_p4 }
  0x4d   : > { %1046 = shalt.err (!%p1043_p3)
}
  0x4e   : > { %s1047_s9 = scalar_lea.vmem %s1343_s12, 64  ;;  %p1055_p13 = scmp.lt.s32.totalorder %s1343_s12, %s1343_s12 }
  0x4f   : > { %p1048_p10 = scmp.ne.s32.totalorder %s1343_s12, %s1047_s9  ;;  %p1056_p0 = scmp.lt.s32.totalorder %s1047_s9, %s1047_s9 }
  0x51   : > { %p1050_p11 = pnand %p1048_p10, %p1353_p8  ;;  %p1057_p2 = por %p1056_p0, %p1055_p13 }
  0x53   : > { %p1051_p12 = pneg %p1050_p11 }
  0x55   : > { %p1058_p5 = pnand %p1057_p2, %p1051_p12 }
  0x57   : > { %1061 = shalt.err (!%p1058_p5)
}
  0x58   : > { %895 = dma.hbm_to_vmem [thread:$0]  (!%p1337_p6), %s1630_s2, 64, %s1343_s12, [#allocation7]  }
  0x59   : > { %s1247_s30 = smov [#allocation11]   ;;  %s1062_s14 = scalar_lea.hbm %s1632_s4, 16 }
  0x5a   : > { %s257_s8 = sshll.u32 %s1247_s30, 4  ;;  %p1063_p7 = scmp.ne.s32.totalorder %s1632_s4, %s1062_s14  ;;  %s258_s8 = int_to_ptr.vmem [resolvable:$true] %s257_s8 }
  0x5b   : > { %p1069_p1 = scmp.lt.u32.totalorder %s1062_s14, %s1632_s4 }
  0x5c   : > { %p1065_p9 = pnand %p1063_p7, %p1353_p8 }
  0x5e   : > { %p1066_p4 = pneg %p1065_p9 }
  0x60   : > { %p1071_p3 = pnand %p1069_p1, %p1066_p4 }
  0x62   : > { %1074 = shalt.err (!%p1071_p3)
}
  0x63   : > { %s1075_s12 = scalar_lea.vmem %s258_s8, 16  ;;  %s1082_s9 = scalar_lea.vmem %s258_s8, 32 }
  0x64   : > { %p1076_p10 = scmp.ne.s32.totalorder %s258_s8, %s1075_s12  ;;  %p1083_p13 = scmp.lt.s32.totalorder %s258_s8, %s258_s8 }
  0x65   : > { %p1084_p0 = scmp.lt.s32.totalorder %s1082_s9, %s1075_s12 }
  0x66   : > { %p1078_p11 = pnand %p1076_p10, %p1353_p8 }
  0x67   : > { %p1085_p2 = por %p1084_p0, %p1083_p13 }
  0x68   : > { %p1079_p12 = pneg %p1078_p11 }
  0x6a   : > { %p1086_p5 = pnand %p1085_p2, %p1079_p12 }
  0x6c   : > { %1089 = shalt.err (!%p1086_p5)
}
  0x6d   : > { %901 = dma.hbm_to_vmem [thread:$0]  (!%p1337_p6), %s1632_s4, 16, %s258_s8, [#allocation10]  }
  0x6e   : > { %s816_s18 = sadd.s32 4294967294, %s1242_s26   ;;  %s40_s30 = sadd.s32 1, %s1238_s25 }
  0x6f   : > { %p42_p8 = scmp.ge.s32.totalorder %s40_s30, 2  ;;  %s49_s10 = sadd.s32 1, %s1230_s23 }
  0x70   : > { %p56_p7 = scmp.ne.s32.totalorder %s1230_s23, %s1226_s22  ;;  %p57_p9 = scmp.eq.s32.totalorder %s1242_s26, 0 }
  0x71   : > { %s1662_s30 = smov (%p42_p8, %s40_s30), 0  ;;  %p62_p1 = scmp.ne.s32.totalorder %s1226_s22, %s1222_s21 }
  0x72   : > { %p1441_p4 = por %p57_p9, %p56_p7  ;;  %s44_s8 = ssub.s32 %s1238_s25, %s1662_s30 }
  0x73   : > { %p172_p6 = scmp.eq.s32.totalorder %s815_s27, 1  ;;  %p47_p3 = scmp.eq.s32.totalorder %s44_s8, 0 }
  0x74   : > { %p1646_p10 = scmp.ne.s32.totalorder %s1640_s28, 0  ;;  %p178_p13 = scmp.eq.s32.totalorder %s816_s18, 1 }
  0x75   : > { %p1457_p12 = por %p172_p6, %p56_p7  ;;  %p917_p2 = scmp.lt.s32.totalorder %s1242_s26, 2 }
  0x76   : > { %p1453_p11 = por %p1646_p10, %p62_p1  ;;  %p1464_p0 = por %p178_p13, %p62_p1 }
  0x77   : > { %s1648_s14 = scalar_select %p1457_p12, 1, 0 }
  0x78   : > { %s1462_s15 = scalar_select %p47_p3, %s1230_s23, %s49_s10  }
  0x79   : > { %s1649_s16 = scalar_select %p1464_p0, 1, 0 }
  0x7a   : > { %s268_s17 = sand.u32 1, %s1230_s23   ;;  %s824_s27 = sshll.u32 %s1238_s25, 7 }
  0x7b   : > { %s823_s19 = sshll.u32 %s268_s17, 3  ;;  %s1474_s20 = scalar_lea.hbm %s1628_s0, %s824_s27 }
  0x7c   : > { %s272_s7 = scalar_lea.vmem [#allocation3], %s823_s19  ;;  %p1478_p5 = pnand %p917_p2, %p1441_p4 }
  0x7d   : > { %s280_s18 = sshll.u32 %s272_s7, 4  ;;  %s269_s8 = scalar_lea.sflag [#allocation4], %s268_s17  ;;  %s1482_s18 = int_to_ptr.vmem [resolvable:$true] %s280_s18 }
  0x7e   : > { %s1090_s1 = scalar_lea.hbm %s1474_s20, 128  ;;  %p1092_p7 = pneg %p1478_p5 }
  0x7f   : > { %p1091_p8 = scmp.ne.s32.totalorder %s1474_s20, %s1090_s1  ;;  %s1095_s11 = scalar_lea.hbm %s1628_s0, 256 }
  0x80   : > { %p1096_p4 = scmp.lt.u32.totalorder %s1474_s20, %s1628_s0  ;;  %p1097_p6 = scmp.lt.u32.totalorder %s1095_s11, %s1090_s1 }
  0x81   : > { %p1093_p9 = pnand %p1092_p7, %p1091_p8  ;;  %p1099_p10 = scmp.lt.u32.totalorder %s1090_s1, %s1474_s20 }
  0x82   : > { %p1098_p3 = por %p1097_p6, %p1096_p4 }
  0x83   : > { %p1094_p1 = pneg %p1093_p9 }
  0x84   : > { %p1100_p13 = por %p1099_p10, %p1098_p3 }
  0x86   : > { %p1101_p2 = pnand %p1100_p13, %p1094_p1 }
  0x88   : > { %1104 = shalt.err (!%p1101_p2)
}
  0x89   : > { %s1105_s17 = scalar_lea.vmem %s1482_s18, 128  ;;  %s1248_s7 = smov [#allocation3]  }
  0x8a   : > { %p1106_p8 = scmp.ne.s32.totalorder %s1482_s18, %s1105_s17  ;;  %s1110_s27 = sshll.u32 %s1248_s7, 4  ;;  %s1111_s27 = int_to_ptr.vmem [resolvable:$false] %s1110_s27 }
  0x8b   : > { %s1112_s19 = scalar_lea.vmem %s1111_s27, 256  ;;  %p1113_p12 = scmp.lt.s32.totalorder %s1482_s18, %s1111_s27 }
  0x8c   : > { %p1108_p9 = pnand %p1106_p8, %p1092_p7  ;;  %p1114_p4 = scmp.lt.s32.totalorder %s1112_s19, %s1105_s17 }
  0x8e   : > { %p1109_p0 = pneg %p1108_p9  ;;  %p1115_p6 = por %p1114_p4, %p1113_p12 }
  0x90   : > { %p1116_p3 = pnand %p1115_p6, %p1109_p0 }
  0x92   : > { %1119 = shalt.err (!%p1116_p3)
}
  0x93   : > { %905 = dma.hbm_to_vmem [thread:$0]  (!%p1478_p5), %s1474_s20, 128, %s1482_s18, %s269_s8  }
  0x94   : > { %p1651_p1 = scmp.ne.s32.totalorder %s1641_s29, 0 }
  0x95   : > { %s1512_s1 = sand.u32 (!%p1651_p1), 1, %s1226_s22  }
  0x96   : > { %289 = sbr.rel (%p1651_p1) target bundleno = 551 (0x227), region = 40  ;;  %s826_s11 = sshll.u32 (!%p1651_p1), %s1512_s1, 3 }
  0x97   : > { %s292_s12 = scalar_lea.sflag (!%p1651_p1), [#allocation4], %s1512_s1  ;;  %s295_s9 = scalar_lea.vmem (!%p1651_p1), [#allocation3], %s826_s11 }
  0x9d   : > { %1201 = dma.done.wait (%p1453_p11), %s292_s12, 128  }
  0x9e   : > { %1203 = vsyncadd (%p1453_p11), %s292_s12, 4294967168  ;;  %p1652_p12 = scmp.ne.s32.totalorder %s1640_s28, 0 }
  0xa0   : > { %1205 = dma.done.wait (%p1652_p12), [#allocation7], 128  }
  0xa1   : > { %1207 = vsyncadd (%p1652_p12), [#allocation7], 4294967168 }
  0xa2   : > { %1209 = dma.done.wait (%p1652_p12), [#allocation10], 80  }
  0xa3   : > { %1211 = vsyncadd (%p1652_p12), [#allocation10], 4294967216  ;;  %v1249_v0 = vmov 0.0   ;;  %vm1250_vm0 = vmmov 0   ;;  %vm355_vm1 = vcmask 25600   ;;  %vm375_vm2 = vcmask 1043456  }
  0xa4   : > { %857 = vmatprep.subr.mxu1 %v1249_v0  ;;  %859 = vmatprep.mubr.msk.f32.mxu1 %vm1250_vm0, %v1249_v0  ;;  %356 = vst.msk [vmem:[#allocation2] sm:$0x3] %vm355_vm1, %v1249_v0  ;;  %v346_v1 = vld [vmem:[%s295_s9] sm:$0xff]  ;;  %v365_v2 = vld [vmem:[#allocation6] sm:$0xf]  ;;  %s1251_s29 = smov 124  }
  0xa5   : > { %852 = vmatprep.subr.mxu0 %v1249_v0  ;;  %854 = vmatprep.mubr.msk.f32.mxu0 %vm1250_vm0, %v1249_v0  ;;  %v366_v3 = vld [vmem:[#allocation8] sm:$0xf]  ;;  %vm363_vm3 = vcmask 31750   ;;  %vm361_vm4 = vcmask 1041408   ;;  %vm372_vm5 = vcmask 31744   ;;  %vm368_vm6 = vcmask 1046528  }
  0xa6   : > { %348 = vrot.lane.b32.xlu0 %v346_v1, %s1251_s29  ;;  %858 = vmatpush3.msk.msra.mxu1 %vm375_vm2, %v365_v2  ;;  %v524_v11 = vld [vmem:[#allocation9] sm:$0xf]  ;;  %s832_s28 = sshll.u32 %s1512_s1, 1  ;;  %v839_v19 = vld [vmem:[#allocation11] ss:$0 sm:$0xff]  ;;  %s842_s20 = sshll.u32 %s1234_s24, 7 }
  0xa7   : > { %853 = vmatpush3.msk.msra.mxu0 %vm375_vm2, %v366_v3  ;;  %s1537_s13 = scalar_lea.vmem [#allocation13], %s832_s28  ;;  %s337_s18 = scalar_lea.vmem [#allocation12], %s826_s11 }
  0xa8   : > { %862 = vmatprep.subr.mxu0 %v1249_v0  ;;  %613 = vst [vmem:[%s1537_s13] sm:$0x3] %v1249_v0  ;;  %s652_s10 = sshll.u32 %s337_s18, 4  ;;  %s1546_s7 = scalar_lea.hbm %s1633_s5, %s842_s20  ;;  %s1548_s10 = int_to_ptr.vmem [resolvable:$true] %s652_s10 }
  0xa9   : > { %s633_s27 = scalar_lea.sflag [#allocation5], %s1512_s1  ;;  %s1120_s19 = scalar_lea.vmem %s1548_s10, 128 }
  0xaa   : > { %p1121_p11 = scmp.ne.s32.totalorder %s1548_s10, %s1120_s19  ;;  %p1653_p0 = scmp.ne.s32.totalorder %s1648_s14, 0 }
  0xab   : > { %v357_v5 = vld [vmem:[#allocation2] sm:$0x3]  ;;  %s1252_s11 = smov [#allocation12]  }
  0xac   : > { %p1122_p5 = pnand %p1121_p11, %p1653_p0  ;;  %s1124_s12 = sshll.u32 %s1252_s11, 4  ;;  %s1125_s12 = int_to_ptr.vmem [resolvable:$false] %s1124_s12 }
  0xad   : > { %s1126_s9 = scalar_lea.vmem %s1125_s12, 256  ;;  %p1127_p10 = scmp.lt.s32.totalorder %s1548_s10, %s1125_s12 }
  0xae   : > { %p1123_p7 = pneg %p1122_p5  ;;  %p1128_p13 = scmp.lt.s32.totalorder %s1126_s9, %s1120_s19 }
  0xb0   : > { %p1129_p2 = por %p1128_p13, %p1127_p10 }
  0xb2   : > { %p1130_p8 = pnand %p1129_p2, %p1123_p7 }
 0x118   : > { %v349_v4 = vpop.permute.xlu0 %348 }
 0x119   : > { %v351_v6 = vmax.f32 %v346_v1, %v349_v4 }
 0x11b   : > { %v359_v7 = vrot.slane %v351_v6, 6  ;;  %364 = vst.msk [vmem:[#allocation2 - $0x6] sm:$0xc0] %vm363_vm3, %v351_v6 }
 0x11d   : > { %v370_v8 = vrot.slane %v359_v7, 1  ;;  %v362_v9 = vsel %vm361_vm4, %v357_v5, %v359_v7 }
 0x11e   : > { %v369_v10 = vrot.slane %v362_v9, 1  ;;  %860 = vmatmul.mubr.msk.f32.vlgmr.msra.gmra.mrb[0].mxu1 %vm372_vm5, %v362_v9 }
 0x120   : > { %v371_v12 = vsel %vm368_vm6, %v369_v10, %v370_v8 }
 0x121   : > { %855 = vmatmul.mubr.msk.f32.vlgmr.msra.gmra.mrb[0].mxu0 %vm372_vm5, %v371_v12 }
 0x122   : > { %863 = vmatpush3.msk.msra.mxu0 %vm375_vm2, %v524_v11  ;;  %864 = vmatprep.mubr.msk.f32.mxu0 %vm1250_vm0, %v1249_v0 }
 0x125   : > { %865 = vmatmul.mubr.msk.f32.vlgmr.msra.gmra.mrb[2].mxu0 %vm372_vm5, %v351_v6 }
 0x1f1   : > { %v520_v13 = vpop.f32.mrb[0].mxu1 }
 0x1f2   : > { %v861_v14 = vpop.f32.mrb[1].mxu1 }
 0x1f4   : > { %v445_v15 = vpop.f32.mrb[0].mxu0 }
 0x1f5   : > { %v521_v16 = vadd.f32 %v520_v13, %v445_v15  ;;  %v856_v17 = vpop.f32.mrb[1].mxu0 }
 0x1f8   : > { %v596_v18 = vpop.f32.mrb[2].mxu0 }
 0x1f9   : > { %v600_v20 = vadd.f32 %v596_v18, %v521_v16  ;;  %v866_v21 = vpop.f32.mrb[3].mxu0 }
 0x1fb   : > { %v608_v22 = vadd.f32 %v839_v19, %v600_v20 }
 0x1fd   : > { %v614_v23 = vrot.slane %v608_v22, 4  ;;  %v620_v24 = vmul.f32 %v608_v22, %v608_v22  ;;  %609 = vst [vmem:[%s337_s18] sm:$0xff] %v608_v22 }
 0x1fe   : > { %1133 = shalt.err (!%p1130_p8)
}
 0x1ff   : > { %s1134_s29 = scalar_lea.hbm %s1546_s7, 128  ;;  %s1138_s18 = scalar_lea.hbm %s1633_s5, 256 }
 0x200   : > { %p1135_p9 = scmp.ne.s32.totalorder %s1546_s7, %s1134_s29  ;;  %p1139_p3 = scmp.lt.u32.totalorder %s1546_s7, %s1633_s5 }
 0x201   : > { %p1140_p1 = scmp.lt.u32.totalorder %s1138_s18, %s1134_s29  ;;  %p1142_p11 = scmp.lt.u32.totalorder %s1134_s29, %s1546_s7 }
 0x202   : > { %p1136_p4 = pnand %p1135_p9, %p1653_p0 }
 0x203   : > { %p1141_p12 = por %p1140_p1, %p1139_p3 }
 0x204   : > { %p1137_p6 = pneg %p1136_p4 }
 0x205   : > { %p1143_p5 = por %p1142_p11, %p1141_p12 }
 0x207   : > { %p1144_p7 = pnand %p1143_p5, %p1137_p6 }
 0x209   : > { %1147 = shalt.err (!%p1144_p7)
}
 0x20a   : > { %885 = dma.vmem_to_hbm [thread:$0]  (%p1653_p0), %s1548_s10, 128, %s1546_s7, %s633_s27   ;;  %v615_v25 = vadd.f32 %v614_v23, %v608_v22  ;;  %v621_v26 = vrot.slane %v620_v24, 4  ;;  %vm628_vm7 = vcmask 1040384   ;;  %v627_v36 = vld [vmem:[%s1537_s13] sm:$0x3] }
 0x20b   : > { %s843_s19 = sshll.u32 %s1234_s24, 5  ;;  %s665_s11 = sshll.u32 %s1537_s13, 4  ;;  %s1580_s11 = int_to_ptr.vmem [resolvable:$true] %s665_s11 }
 0x20c   : > { %v616_v27 = vrot.slane %v615_v25, 2  ;;  %v622_v28 = vadd.f32 %v621_v26, %v620_v24  ;;  %s1578_s27 = scalar_lea.hbm %s1634_s6, %s843_s19  ;;  %s638_s12 = scalar_lea.sflag [#allocation14], %s1512_s1 }
 0x20d   : > { %s1148_s9 = scalar_lea.vmem %s1580_s11, 32  ;;  %s1253_s24 = smov [#allocation13]  }
 0x20e   : > { %v617_v29 = vadd.f32 %v616_v27, %v615_v25  ;;  %v623_v30 = vrot.slane %v622_v28, 2  ;;  %p1149_p10 = scmp.ne.s32.totalorder %s1580_s11, %s1148_s9  ;;  %s1152_s29 = sshll.u32 %s1253_s24, 4  ;;  %s1153_s29 = int_to_ptr.vmem [resolvable:$false] %s1152_s29 }
 0x20f   : > { %s1154_s28 = scalar_lea.vmem %s1153_s29, 64  ;;  %p1155_p8 = scmp.lt.s32.totalorder %s1580_s11, %s1153_s29 }
 0x210   : > { %v618_v31 = vrot.slane %v617_v29, 1  ;;  %v624_v32 = vadd.f32 %v623_v30, %v622_v28  ;;  %p1150_p13 = pnand %p1149_p10, %p1653_p0  ;;  %p1156_p9 = scmp.lt.s32.totalorder %s1154_s28, %s1148_s9 }
 0x212   : > { %v625_v33 = vrot.slane %v624_v32, 1  ;;  %v619_v34 = vadd.f32 %v618_v31, %v617_v29  ;;  %p1151_p2 = pneg %p1150_p13  ;;  %p1157_p4 = por %p1156_p9, %p1155_p8 }
 0x214   : > { %v626_v35 = vadd.f32 %v625_v33, %v624_v32  ;;  %p1158_p6 = pnand %p1157_p4, %p1151_p2 }
 0x216   : > { %v629_v37 = vsel %vm628_vm7, %v619_v34, %v626_v35 }
 0x217   : > { %v630_v38 = vadd.f32 %v629_v37, %v627_v36 }
 0x219   : > { %631 = vst [vmem:[%s1537_s13] sm:$0x3] %v630_v38 }
 0x21a   : > { %1161 = shalt.err (!%p1158_p6)
}
 0x21b   : > { %s1162_s1 = scalar_lea.hbm %s1578_s27, 32  ;;  %s1166_s18 = scalar_lea.hbm %s1634_s6, 64 }
 0x21c   : > { %p1163_p3 = scmp.ne.s32.totalorder %s1578_s27, %s1162_s1  ;;  %p1167_p11 = scmp.lt.u32.totalorder %s1578_s27, %s1634_s6 }
 0x21d   : > { %p1168_p5 = scmp.lt.u32.totalorder %s1166_s18, %s1162_s1  ;;  %p1170_p10 = scmp.lt.u32.totalorder %s1162_s1, %s1578_s27 }
 0x21e   : > { %p1164_p1 = pnand %p1163_p3, %p1653_p0 }
 0x21f   : > { %p1169_p7 = por %p1168_p5, %p1167_p11 }
 0x220   : > { %p1165_p12 = pneg %p1164_p1 }
 0x221   : > { %p1171_p13 = por %p1170_p10, %p1169_p7 }
 0x223   : > { %p1172_p2 = pnand %p1171_p13, %p1165_p12 }
 0x225   : > { %1175 = shalt.err (!%p1172_p2)
}
 0x226   : > { %886 = dma.vmem_to_hbm [thread:$0]  (%p1653_p0), %s1580_s11, 32, %s1578_s27, %s638_s12  }
 0x227 PF: > { %s677_s19 = sand.u32 1, %s1222_s21   ;;  %p1654_p8 = scmp.ne.s32.totalorder %s1649_s16, 0 }
 0x228   : > { %p1655_p9 = scmp.ge.s32.totalorder %s1242_s26, 2  ;;  %s678_s10 = scalar_lea.sflag [#allocation5], %s677_s19 }
 0x22a   : > { %p907_p4 = pnand %p1655_p9, %p1654_p8 }
 0x22c   : > { %1213 = dma.done.wait (!%p907_p4), %s678_s10, 128  }
 0x22d   : > { %1215 = vsyncadd (!%p907_p4), %s678_s10, 4294967168  ;;  %s687_s7 = scalar_lea.sflag [#allocation14], %s677_s19 }
 0x22e   : > { %1217 = dma.done.wait (!%p907_p4), %s687_s7, 32  }
 0x22f   : > { %1219 = vsyncadd (!%p907_p4), %s687_s7, 4294967264  ;;  %s28_s26 = sadd.s32 1, %s1242_s26   ;;  %s1656_s21 = smov %s1226_s22 }
 0x230   : > { %p25_p6 = scmp.ge.s32.totalorder %s28_s26, 4   ;;  %s1657_s22 = smov %s1230_s23 }
 0x231   : > { %s1658_s23 = smov %s1462_s15  ;;  %s1659_s24 = smov %s1238_s25 }
 0x232   : > { %s1660_s25 = smov %s1662_s30  ;;  %27 = sbr.rel (!%p25_p6) target bundleno = 12 (0xc), region = 126 }
 0x239   :  { %692 = vsyncpa [#allocation4], 1 }
 0x23a   :  { %694 = vsyncpa [#allocation4 + $0x1], 1 }
 0x23b   :  { %695 = vsyncpa [#allocation7], 1 }
 0x23c   :  { %696 = vsyncpa [#allocation10], 1 }
 0x23d   :  { %697 = vsyncpa [#allocation5], 1 }
 0x23e   :  { %699 = vsyncpa [#allocation5 + $0x1], 1 }
 0x23f   :  { %700 = vsyncpa [#allocation14], 1 }
 0x240   :  { %702 = vsyncpa [#allocation14 + $0x1], 1 }

// kernel: down_causal_forward.4
= control target key start
LH: loop header
LB: loop body
LE: loop exit
PB: predicated region body
PF: predicated region fallthrough
CT: control target
= control target key end

     0   :  { %s1723_s0 = inlined_call_operand.hbm [shape: f32[2,8,128], index: 0, kind: input, shape index: {}]   ;;  %s1724_s1 = inlined_call_operand.hbm [shape: f32[1,128], index: 1, kind: input, shape index: {}]   ;;  %s1725_s2 = inlined_call_operand.hbm [shape: f32[1,128], index: 2, kind: input, shape index: {}]   ;;  %s1726_s3 = inlined_call_operand.hbm [shape: f32[384,128], index: 3, kind: input, shape index: {}]   ;;  %s1727_s4 = inlined_call_operand.hbm [shape: f32[1,128], index: 4, kind: input, shape index: {}]   ;;  %s1728_s5 = inlined_call_operand.hbm [shape: f32[2,8,128], index: 5, kind: output, shape index: {0}]   ;;  %s1729_s6 = inlined_call_operand.hbm [shape: f32[2,2,128], index: 6, kind: output, shape index: {1}]  }
   0x1   :  { %1734 = sst [smem:[#allocation20_spill]] %s1724_s1 }
   0x2   :  { %12 = vsyncpa [#allocation4], 0 }
   0x3   :  { %14 = vsyncpa [#allocation4 + $0x1], 0 }
   0x4   :  { %15 = vsyncpa [#allocation7], 0 }
   0x5   :  { %16 = vsyncpa [#allocation10], 0 }
   0x6   :  { %17 = vsyncpa [#allocation5], 0 }
   0x7   :  { %19 = vsyncpa [#allocation5 + $0x1], 0 }
   0x8   :  { %20 = vsyncpa [#allocation14], 0 }
   0x9   :  { %22 = vsyncpa [#allocation14 + $0x1], 0  ;;  %s1380_s21 = smov 0   ;;  %s1382_s22 = smov 0  }
   0xa   :  { %s1384_s23 = smov 0   ;;  %s1386_s24 = smov 0  }
   0xb   :  { %s1388_s25 = smov 0   ;;  %s1390_s26 = smov 0  }
   0xc LB: > { %s784_s27 = sadd.s32 4294967295, %s1331_s26   ;;  %p786_p0 = scmp.ge.s32.totalorder %s1331_s26, 1  ;;  %s1331_s26 = sphi %s1390_s26, %s28_s26   ;;  %s1327_s25 = sphi %s1388_s25, %s1755_s25   ;;  %s1323_s24 = sphi %s1386_s24, %s1754_s24   ;;  %s1319_s23 = sphi %s1384_s23, %s1753_s23   ;;  %s1315_s22 = sphi %s1382_s22, %s1752_s22   ;;  %s1311_s21 = sphi %s1380_s21, %s1751_s21  }
   0xd   : > { %p1414_p1 = scmp.eq.s32.totalorder %s784_s27, 0  ;;  %p211_p2 = scmp.lt.s32.totalorder %s1331_s26, 3 }
   0xe   : > { %s1333_s30 = smov [#allocation6]   ;;  %s1334_s8 = smov [#allocation9]  }
   0xf   : > { %s1735_s28 = scalar_select %p1414_p1, 1, 0 }
  0x10   : > { %p1419_p3 = pnand %p786_p0, %p211_p2  ;;  %s224_s7 = sshll.u32 %s1333_s30, 4  ;;  %s225_s7 = int_to_ptr.vmem [resolvable:$true] %s224_s7 }
  0x11   : > { %s245_s9 = sshll.u32 %s1334_s8, 4  ;;  %s1335_s11 = smov [#allocation8]   ;;  %s1432_s9 = int_to_ptr.vmem [resolvable:$true] %s245_s9 }
  0x12   : > { %s1736_s29 = scalar_select %p1419_p3, 1, 0 }
  0x13   : > { %p976_p5 = pneg %p1419_p3  ;;  %s1434_s12 = sshll.u32 %s1335_s11, 4  ;;  %s236_s12 = int_to_ptr.vmem [resolvable:$true] %s1434_s12 }
  0x14   : > { %s1738_s1 = sld [smem:[#allocation20_spill]] }
  0x15   : > { %p1428_p6 = pnand %p976_p5, %p1414_p1 }
  0x17   : > { %p1444_p8 = pneg %p1428_p6 }
  0x1a   : > { %s1067_s15 = scalar_lea.hbm %s1738_s1, 16 }
  0x1b   : > { %p1068_p7 = scmp.ne.s32.totalorder %s1738_s1, %s1067_s15  ;;  %p1074_p11 = scmp.lt.u32.totalorder %s1067_s15, %s1738_s1 }
  0x1d   : > { %p1070_p9 = pnand %p1444_p8, %p1068_p7 }
  0x1f   : > { %p1071_p10 = pneg %p1070_p9 }
  0x21   : > { %p1076_p12 = pnand %p1074_p11, %p1071_p10 }
  0x23   : > { %1079 = shalt.err (!%p1076_p12)
}
  0x24   : > { %s1080_s30 = scalar_lea.vmem %s225_s7, 16  ;;  %s1087_s8 = scalar_lea.vmem %s225_s7, 32 }
  0x25   : > { %p1081_p13 = scmp.ne.s32.totalorder %s225_s7, %s1080_s30  ;;  %p1088_p5 = scmp.lt.s32.totalorder %s225_s7, %s225_s7 }
  0x26   : > { %p1089_p4 = scmp.lt.s32.totalorder %s1087_s8, %s1080_s30 }
  0x27   : > { %p1083_p0 = pnand %p1081_p13, %p1444_p8 }
  0x28   : > { %p1090_p3 = por %p1089_p4, %p1088_p5 }
  0x29   : > { %p1084_p2 = pneg %p1083_p0 }
  0x2b   : > { %p1091_p1 = pnand %p1090_p3, %p1084_p2 }
  0x2d   : > { %1094 = shalt.err (!%p1091_p1)
}
  0x2e   : > { %979 = dma.hbm_to_vmem [thread:$0]  (!%p1428_p6), %s1738_s1, 16, %s225_s7, [#allocation7]  }
  0x2f   : > { %s1095_s16 = scalar_lea.hbm %s1726_s3, 6144 }
  0x30   : > { %p1096_p7 = scmp.ne.s32.totalorder %s1726_s3, %s1095_s16  ;;  %p1102_p1 = scmp.lt.u32.totalorder %s1095_s16, %s1726_s3 }
  0x32   : > { %p1098_p9 = pnand %p1096_p7, %p1444_p8 }
  0x34   : > { %p1099_p4 = pneg %p1098_p9 }
  0x36   : > { %p1104_p3 = pnand %p1102_p1, %p1099_p4 }
  0x38   : > { %1107 = shalt.err (!%p1104_p3)
}
  0x39   : > { %s1108_s7 = scalar_lea.vmem %s1432_s9, 6144  ;;  %p1116_p13 = scmp.lt.s32.totalorder %s1432_s9, %s1432_s9 }
  0x3a   : > { %p1109_p10 = scmp.ne.s32.totalorder %s1432_s9, %s1108_s7  ;;  %p1117_p0 = scmp.lt.s32.totalorder %s1108_s7, %s1108_s7 }
  0x3c   : > { %p1111_p11 = pnand %p1109_p10, %p1444_p8  ;;  %p1118_p2 = por %p1117_p0, %p1116_p13 }
  0x3e   : > { %p1112_p12 = pneg %p1111_p11 }
  0x40   : > { %p1119_p5 = pnand %p1118_p2, %p1112_p12 }
  0x42   : > { %1122 = shalt.err (!%p1119_p5)
}
  0x43   : > { %s1336_s8 = smov 128   ;;  %s1337_s11 = smov 8  }
  0x44   : > { %985 = dma.hbm_to_vmem [thread:$0]  (!%p1428_p6), %s1726_s3, 6144, %s1432_s9, [#allocation10], %s1336_s8, %s1336_s8, %s1337_s11  }
  0x45   : > { %s1123_s17 = scalar_lea.hbm %s1725_s2, 16 }
  0x46   : > { %p1124_p7 = scmp.ne.s32.totalorder %s1725_s2, %s1123_s17  ;;  %p1130_p1 = scmp.lt.u32.totalorder %s1123_s17, %s1725_s2 }
  0x48   : > { %p1126_p9 = pnand %p1124_p7, %p1444_p8 }
  0x4a   : > { %p1127_p4 = pneg %p1126_p9 }
  0x4c   : > { %p1132_p3 = pnand %p1130_p1, %p1127_p4 }
  0x4e   : > { %1135 = shalt.err (!%p1132_p3)
}
  0x4f   : > { %s1136_s13 = scalar_lea.vmem %s236_s12, 16  ;;  %s1143_s9 = scalar_lea.vmem %s236_s12, 32 }
  0x50   : > { %p1137_p10 = scmp.ne.s32.totalorder %s236_s12, %s1136_s13  ;;  %p1144_p13 = scmp.lt.s32.totalorder %s236_s12, %s236_s12 }
  0x51   : > { %p1145_p0 = scmp.lt.s32.totalorder %s1143_s9, %s1136_s13 }
  0x52   : > { %p1139_p11 = pnand %p1137_p10, %p1444_p8 }
  0x53   : > { %p1146_p2 = por %p1145_p0, %p1144_p13 }
  0x54   : > { %p1140_p12 = pneg %p1139_p11 }
  0x56   : > { %p1147_p5 = pnand %p1146_p2, %p1140_p12 }
  0x58   : > { %1150 = shalt.err (!%p1147_p5)
}
  0x59   : > { %982 = dma.hbm_to_vmem [thread:$0]  (!%p1428_p6), %s1725_s2, 16, %s236_s12, [#allocation7]  }
  0x5a   : > { %s1338_s14 = smov [#allocation11]   ;;  %s1151_s19 = scalar_lea.hbm %s1727_s4, 16 }
  0x5b   : > { %s259_s15 = sshll.u32 %s1338_s14, 4  ;;  %p1152_p7 = scmp.ne.s32.totalorder %s1727_s4, %s1151_s19  ;;  %s260_s15 = int_to_ptr.vmem [resolvable:$true] %s259_s15 }
  0x5c   : > { %p1158_p1 = scmp.lt.u32.totalorder %s1151_s19, %s1727_s4 }
  0x5d   : > { %p1154_p9 = pnand %p1152_p7, %p1444_p8 }
  0x5f   : > { %p1155_p4 = pneg %p1154_p9 }
  0x61   : > { %p1160_p3 = pnand %p1158_p1, %p1155_p4 }
  0x63   : > { %1163 = shalt.err (!%p1160_p3)
}
  0x64   : > { %s1164_s12 = scalar_lea.vmem %s260_s15, 16  ;;  %s1171_s9 = scalar_lea.vmem %s260_s15, 32 }
  0x65   : > { %p1165_p10 = scmp.ne.s32.totalorder %s260_s15, %s1164_s12  ;;  %p1172_p13 = scmp.lt.s32.totalorder %s260_s15, %s260_s15 }
  0x66   : > { %p1173_p0 = scmp.lt.s32.totalorder %s1171_s9, %s1164_s12 }
  0x67   : > { %p1167_p11 = pnand %p1165_p10, %p1444_p8 }
  0x68   : > { %p1174_p2 = por %p1173_p0, %p1172_p13 }
  0x69   : > { %p1168_p12 = pneg %p1167_p11 }
  0x6b   : > { %p1175_p5 = pnand %p1174_p2, %p1168_p12 }
  0x6d   : > { %1178 = shalt.err (!%p1175_p5)
}
  0x6e   : > { %988 = dma.hbm_to_vmem [thread:$0]  (!%p1428_p6), %s1727_s4, 16, %s260_s15, [#allocation10]  }
  0x6f   : > { %s785_s18 = sadd.s32 4294967294, %s1331_s26   ;;  %s40_s14 = sadd.s32 1, %s1327_s25 }
  0x70   : > { %p42_p8 = scmp.ge.s32.totalorder %s40_s14, 2  ;;  %s49_s10 = sadd.s32 1, %s1319_s23 }
  0x71   : > { %p56_p7 = scmp.ne.s32.totalorder %s1319_s23, %s1315_s22  ;;  %p57_p9 = scmp.eq.s32.totalorder %s1331_s26, 0 }
  0x72   : > { %s1757_s14 = smov (%p42_p8, %s40_s14), 0  ;;  %p62_p1 = scmp.ne.s32.totalorder %s1315_s22, %s1311_s21 }
  0x73   : > { %p1528_p4 = por %p57_p9, %p56_p7  ;;  %s44_s15 = ssub.s32 %s1327_s25, %s1757_s14 }
  0x74   : > { %p172_p6 = scmp.eq.s32.totalorder %s784_s27, 1  ;;  %p47_p3 = scmp.eq.s32.totalorder %s44_s15, 0 }
  0x75   : > { %p1741_p10 = scmp.ne.s32.totalorder %s1735_s28, 0  ;;  %p178_p13 = scmp.eq.s32.totalorder %s785_s18, 1 }
  0x76   : > { %p1544_p12 = por %p172_p6, %p56_p7  ;;  %p1004_p2 = scmp.lt.s32.totalorder %s1331_s26, 2 }
  0x77   : > { %p1540_p11 = por %p1741_p10, %p62_p1  ;;  %p1551_p0 = por %p178_p13, %p62_p1 }
  0x78   : > { %s1743_s19 = scalar_select %p1544_p12, 1, 0 }
  0x79   : > { %s1549_s20 = scalar_select %p47_p3, %s1319_s23, %s49_s10  }
  0x7a   : > { %s1744_s30 = scalar_select %p1551_p0, 1, 0 }
  0x7b   : > { %s270_s7 = sand.u32 1, %s1319_s23   ;;  %s793_s27 = sshll.u32 %s1327_s25, 7 }
  0x7c   : > { %s792_s13 = sshll.u32 %s270_s7, 3  ;;  %s1561_s8 = scalar_lea.hbm %s1723_s0, %s793_s27 }
  0x7d   : > { %s274_s11 = scalar_lea.vmem [#allocation3], %s792_s13  ;;  %p1565_p5 = pnand %p1004_p2, %p1528_p4 }
  0x7e   : > { %s282_s18 = sshll.u32 %s274_s11, 4  ;;  %s271_s15 = scalar_lea.sflag [#allocation4], %s270_s7  ;;  %s1569_s18 = int_to_ptr.vmem [resolvable:$true] %s282_s18 }
  0x7f   : > { %s1179_s1 = scalar_lea.hbm %s1561_s8, 128  ;;  %p1181_p7 = pneg %p1565_p5 }
  0x80   : > { %p1180_p8 = scmp.ne.s32.totalorder %s1561_s8, %s1179_s1  ;;  %s1184_s16 = scalar_lea.hbm %s1723_s0, 256 }
  0x81   : > { %p1185_p4 = scmp.lt.u32.totalorder %s1561_s8, %s1723_s0  ;;  %p1186_p6 = scmp.lt.u32.totalorder %s1184_s16, %s1179_s1 }
  0x82   : > { %p1182_p9 = pnand %p1181_p7, %p1180_p8  ;;  %p1188_p10 = scmp.lt.u32.totalorder %s1179_s1, %s1561_s8 }
  0x83   : > { %p1187_p3 = por %p1186_p6, %p1185_p4 }
  0x84   : > { %p1183_p1 = pneg %p1182_p9 }
  0x85   : > { %p1189_p13 = por %p1188_p10, %p1187_p3 }
  0x87   : > { %p1190_p2 = pnand %p1189_p13, %p1183_p1 }
  0x89   : > { %1193 = shalt.err (!%p1190_p2)
}
  0x8a   : > { %s1194_s7 = scalar_lea.vmem %s1569_s18, 128  ;;  %s1339_s11 = smov [#allocation3]  }
  0x8b   : > { %p1195_p8 = scmp.ne.s32.totalorder %s1569_s18, %s1194_s7  ;;  %s1199_s27 = sshll.u32 %s1339_s11, 4  ;;  %s1200_s27 = int_to_ptr.vmem [resolvable:$false] %s1199_s27 }
  0x8c   : > { %s1201_s13 = scalar_lea.vmem %s1200_s27, 256  ;;  %p1202_p12 = scmp.lt.s32.totalorder %s1569_s18, %s1200_s27 }
  0x8d   : > { %p1197_p9 = pnand %p1195_p8, %p1181_p7  ;;  %p1203_p4 = scmp.lt.s32.totalorder %s1201_s13, %s1194_s7 }
  0x8f   : > { %p1198_p0 = pneg %p1197_p9  ;;  %p1204_p6 = por %p1203_p4, %p1202_p12 }
  0x91   : > { %p1205_p3 = pnand %p1204_p6, %p1198_p0 }
  0x93   : > { %1208 = shalt.err (!%p1205_p3)
}
  0x94   : > { %992 = dma.hbm_to_vmem [thread:$0]  (!%p1565_p5), %s1561_s8, 128, %s1569_s18, %s271_s15  }
  0x95   : > { %p1746_p1 = scmp.ne.s32.totalorder %s1736_s29, 0 }
  0x96   : > { %s1599_s1 = sand.u32 (!%p1746_p1), 1, %s1315_s22  }
  0x97   : > { %291 = sbr.rel (%p1746_p1) target bundleno = 461 (0x1cd), region = 40  ;;  %s795_s16 = sshll.u32 (!%p1746_p1), %s1599_s1, 3 }
  0x98   : > { %s294_s12 = scalar_lea.sflag (!%p1746_p1), [#allocation4], %s1599_s1  ;;  %s1605_s9 = scalar_lea.vmem (!%p1746_p1), [#allocation3], %s795_s16 }
  0x9e   : > { %1290 = dma.done.wait (%p1540_p11), %s294_s12, 128  }
  0x9f   : > { %1292 = vsyncadd (%p1540_p11), %s294_s12, 4294967168  ;;  %p1747_p12 = scmp.ne.s32.totalorder %s1735_s28, 0 }
  0xa1   : > { %1294 = dma.done.wait (%p1747_p12), [#allocation7], 32  }
  0xa2   : > { %1296 = vsyncadd (%p1747_p12), [#allocation7], 4294967264 }
  0xa3   : > { %1298 = dma.done.wait (%p1747_p12), [#allocation10], 6160  }
  0xa4   : > { %1300 = vsyncadd (%p1747_p12), [#allocation10], 4294961136  ;;  %v1340_v0 = vmov 0.0|0.0   ;;  %v1341_v1 = vmov 0.0   ;;  %vm1342_vm0 = vmmov 0   ;;  %v399_v2 = vld [vmem:[#allocation9 + $0x80] sm:$0xff] }
  0xa5   : > { %930 = vmatprep.subr.bf16.mxu1 %v1340_v0  ;;  %369 = vst [vmem:[#allocation2] sm:$0x3] %v1341_v1  ;;  %895 = vmatprep.mubr.msk.f32.mxu1 %vm1342_vm0, %v1341_v1  ;;  %v400_v3 = vld [vmem:[#allocation9 + $0x88] sm:$0xff]  ;;  %v383_v4 = vld [vmem:[#allocation9] sm:$0xff]  ;;  %v401_v7 = vld [vmem:[#allocation9 + $0x90] sm:$0xff]  ;;  %vm374_vm1 = vcmask 1041408  }
  0xa6   : > { %v898_v5 = vpack.c.bf16 %v400_v3, %v399_v2  ;;  %v384_v6 = vld [vmem:[#allocation9 + $0x8] sm:$0xff]  ;;  %v402_v8 = vld [vmem:[#allocation9 + $0x98] sm:$0xff]  ;;  %v385_v11 = vld [vmem:[#allocation9 + $0x10] sm:$0xff]  ;;  %vm378_vm2 = vcmask 1046528   ;;  %s801_s28 = sshll.u32 %s1599_s1, 1  ;;  %s807_s17 = sshll.u32 %s1323_s24, 7 }
  0xa7   : > { %v900_v9 = vpack.c.bf16 %v384_v6, %v383_v4  ;;  %v902_v10 = vpack.c.bf16 %v402_v8, %v401_v7  ;;  %v386_v12 = vld [vmem:[#allocation9 + $0x18] sm:$0xff]  ;;  %v415_v13 = vld [vmem:[#allocation9 + $0x100] sm:$0xff]  ;;  %v416_v14 = vld [vmem:[#allocation9 + $0x108] sm:$0xff]  ;;  %s1631_s29 = scalar_lea.vmem [#allocation13], %s801_s28  ;;  %s339_s8 = scalar_lea.vmem [#allocation12], %s795_s16 }
  0xa8   : > { %899 = vmatprep.subr.bf16.mxu0 %v898_v5  ;;  %v403_v15 = vld [vmem:[#allocation9 + $0xa0] sm:$0xff]  ;;  %v404_v16 = vld [vmem:[#allocation9 + $0xa8] sm:$0xff]  ;;  %v904_v17 = vpack.c.bf16 %v386_v12, %v385_v11  ;;  %v931_v18 = vpack.c.bf16 %v416_v14, %v415_v13  ;;  %v417_v19 = vld [vmem:[#allocation9 + $0x110] sm:$0xff]  ;;  %582 = vst [vmem:[%s1631_s29] sm:$0x3] %v1341_v1  ;;  %s621_s18 = sshll.u32 %s339_s8, 4  ;;  %s1641_s7 = scalar_lea.hbm %s1728_s5, %s807_s17  ;;  %s1643_s18 = int_to_ptr.vmem [resolvable:$true] %s621_s18 }
  0xa9   : > { %901 = vmatpush3.bf16.msra.mxu0 %v900_v9  ;;  %v906_v20 = vpack.c.bf16 %v404_v16, %v403_v15  ;;  %v387_v21 = vld [vmem:[#allocation9 + $0x20] sm:$0xff]  ;;  %v388_v22 = vld [vmem:[#allocation9 + $0x28] sm:$0xff]  ;;  %v418_v23 = vld [vmem:[#allocation9 + $0x118] sm:$0xff]  ;;  %s602_s11 = scalar_lea.sflag [#allocation5], %s1599_s1  ;;  %s1209_s27 = scalar_lea.vmem %s1643_s18, 128 }
  0xaa   : > { %903 = vmatprep.subr.bf16.mxu0 %v902_v10  ;;  %932 = vmatpush3.bf16.msra.mxu1 %v931_v18  ;;  %v934_v24 = vpack.c.bf16 %v418_v23, %v417_v19  ;;  %v405_v25 = vld [vmem:[#allocation9 + $0xb0] sm:$0xff]  ;;  %v406_v26 = vld [vmem:[#allocation9 + $0xb8] sm:$0xff]  ;;  %v419_v27 = vld [vmem:[#allocation9 + $0x120] sm:$0xff]  ;;  %v908_v29 = vpack.c.bf16 %v388_v22, %v387_v21  ;;  %p1210_p11 = scmp.ne.s32.totalorder %s1643_s18, %s1209_s27  ;;  %p1748_p0 = scmp.ne.s32.totalorder %s1743_s19, 0 }
  0xab   : > { %933 = vmatprep.subr.bf16.mxu1 %v1340_v0  ;;  %v420_v28 = vld [vmem:[#allocation9 + $0x128] sm:$0xff]  ;;  %v910_v30 = vpack.c.bf16 %v406_v26, %v405_v25  ;;  %v389_v31 = vld [vmem:[#allocation9 + $0x30] sm:$0xff]  ;;  %v390_v32 = vld [vmem:[#allocation9 + $0x38] sm:$0xff]  ;;  %s1343_s13 = smov [#allocation12]  }
  0xac   : > { %v937_v33 = vpack.c.bf16 %v420_v28, %v419_v27  ;;  %v407_v34 = vld [vmem:[#allocation9 + $0xc0] sm:$0xff]  ;;  %v408_v35 = vld [vmem:[#allocation9 + $0xc8] sm:$0xff]  ;;  %v421_v36 = vld [vmem:[#allocation9 + $0x130] sm:$0xff]  ;;  %v912_v38 = vpack.c.bf16 %v390_v32, %v389_v31  ;;  %p1211_p5 = pnand %p1210_p11, %p1748_p0  ;;  %s1213_s16 = sshll.u32 %s1343_s13, 4  ;;  %s1214_s16 = int_to_ptr.vmem [resolvable:$false] %s1213_s16 }
  0xad   : > { %905 = vmatpush3.bf16.msra.mxu0 %v904_v17  ;;  %v422_v37 = vld [vmem:[#allocation9 + $0x138] sm:$0xff]  ;;  %v914_v39 = vpack.c.bf16 %v408_v35, %v407_v34  ;;  %v391_v40 = vld [vmem:[#allocation9 + $0x40] sm:$0xff]  ;;  %v392_v41 = vld [vmem:[#allocation9 + $0x48] sm:$0xff]  ;;  %s1215_s12 = scalar_lea.vmem %s1214_s16, 256  ;;  %p1216_p10 = scmp.lt.s32.totalorder %s1643_s18, %s1214_s16 }
  0xae   : > { %907 = vmatprep.subr.bf16.mxu0 %v906_v20  ;;  %935 = vmatpush3.bf16.msra.mxu1 %v934_v24  ;;  %v940_v42 = vpack.c.bf16 %v422_v37, %v421_v36  ;;  %v409_v43 = vld [vmem:[#allocation9 + $0xd0] sm:$0xff]  ;;  %v410_v44 = vld [vmem:[#allocation9 + $0xd8] sm:$0xff]  ;;  %v423_v45 = vld [vmem:[#allocation9 + $0x140] sm:$0xff]  ;;  %v916_v49 = vpack.c.bf16 %v392_v41, %v391_v40  ;;  %p1212_p7 = pneg %p1211_p5  ;;  %p1217_p13 = scmp.lt.s32.totalorder %s1215_s12, %s1209_s27 }
  0xaf   : > { %936 = vmatprep.subr.bf16.mxu1 %v1340_v0  ;;  %v424_v46 = vld [vmem:[#allocation9 + $0x148] sm:$0xff]  ;;  %v802_v48 = vld [vmem:[#allocation6] ss:$0 sm:$0xff]  ;;  %v803_v51 = vld [vmem:[#allocation8] ss:$0 sm:$0xff]  ;;  %v918_v52 = vpack.c.bf16 %v410_v44, %v409_v43 }
  0xb0   : > { %v348_v47 = vld [vmem:[%s1605_s9] sm:$0xff]  ;;  %v943_v55 = vpack.c.bf16 %v424_v46, %v423_v45  ;;  %v411_v56 = vld [vmem:[#allocation9 + $0xe0] sm:$0xff]  ;;  %v370_v4 = vld [vmem:[#allocation2] sm:$0x3]  ;;  %p1218_p2 = por %p1217_p13, %p1216_p10 }
  0xb1   : > { %909 = vmatpush3.bf16.msra.mxu0 %v908_v29  ;;  %v356_v50 = vmul.f32 %v802_v48, %v348_v47  ;;  %v393_v53 = vld [vmem:[#allocation9 + $0x50] sm:$0xff]  ;;  %v394_v54 = vld [vmem:[#allocation9 + $0x58] sm:$0xff]  ;;  %v412_v57 = vld [vmem:[#allocation9 + $0xe8] sm:$0xff] }
  0xb2   : > { %911 = vmatprep.subr.bf16.mxu0 %v910_v30  ;;  %938 = vmatpush3.bf16.msra.mxu1 %v937_v33  ;;  %v425_v59 = vld [vmem:[#allocation9 + $0x150] sm:$0xff]  ;;  %v426_v60 = vld [vmem:[#allocation9 + $0x158] sm:$0xff]  ;;  %v920_v61 = vpack.c.bf16 %v394_v54, %v393_v53  ;;  %v922_v63 = vpack.c.bf16 %v412_v57, %v411_v56  ;;  %v395_v2 = vld [vmem:[#allocation9 + $0x60] sm:$0xff]  ;;  %p1219_p8 = pnand %p1218_p2, %p1212_p7 }
  0xb3   : > { %939 = vmatprep.subr.bf16.mxu1 %v1340_v0  ;;  %v364_v58 = vadd.f32 %v803_v51, %v356_v50  ;;  %v396_v3 = vld [vmem:[#allocation9 + $0x68] sm:$0xff]  ;;  %v946_v5 = vpack.c.bf16 %v426_v60, %v425_v59  ;;  %v413_v6 = vld [vmem:[#allocation9 + $0xf0] sm:$0xff]  ;;  %v414_v7 = vld [vmem:[#allocation9 + $0xf8] sm:$0xff] }
  0xb4   : > { %v427_v9 = vld [vmem:[#allocation9 + $0x160] sm:$0xff]  ;;  %v428_v10 = vld [vmem:[#allocation9 + $0x168] sm:$0xff]  ;;  %v924_v11 = vpack.c.bf16 %v396_v3, %v395_v2  ;;  %v926_v14 = vpack.c.bf16 %v414_v7, %v413_v6  ;;  %v397_v15 = vld [vmem:[#allocation9 + $0x70] sm:$0xff] }
  0xb5   : > { %913 = vmatpush3.bf16.msra.mxu0 %v912_v38  ;;  %v365_v62 = vmax.f32 %v364_v58, 0.0  ;;  %v398_v16 = vld [vmem:[#allocation9 + $0x78] sm:$0xff]  ;;  %v949_v18 = vpack.c.bf16 %v428_v10, %v427_v9  ;;  %v429_v20 = vld [vmem:[#allocation9 + $0x170] sm:$0xff]  ;;  %v804_v26 = vld [vmem:[#allocation11] ss:$0 sm:$0xff] }
  0xb6   : > { %915 = vmatprep.subr.bf16.mxu0 %v914_v39  ;;  %941 = vmatpush3.bf16.msra.mxu1 %v940_v42  ;;  %v430_v21 = vld [vmem:[#allocation9 + $0x178] sm:$0xff]  ;;  %v928_v22 = vpack.c.bf16 %v398_v16, %v397_v15 }
  0xb7   : > { %942 = vmatprep.subr.bf16.mxu1 %v1340_v0  ;;  %v372_v8 = vrot.slane %v365_v62, 6  ;;  %376 = vst [vmem:[#allocation2 - $0x6] sm:$0xc0] %v365_v62  ;;  %v952_v23 = vpack.c.bf16 %v430_v21, %v429_v20 }
  0xb9   : > { %917 = vmatpush3.bf16.msra.mxu0 %v916_v49  ;;  %v375_v12 = vsel %vm374_vm1, %v370_v4, %v372_v8  ;;  %v380_v13 = vrot.slane %v372_v8, 1 }
  0xba   : > { %919 = vmatprep.subr.bf16.mxu0 %v918_v52  ;;  %944 = vmatpush3.bf16.msra.mxu1 %v943_v55  ;;  %v379_v17 = vrot.slane %v375_v12, 1 }
  0xbb   : > { %945 = vmatprep.subr.bf16.mxu1 %v1340_v0 }
  0xbc   : > { %v381_v19 = vsel %vm378_vm2, %v379_v17, %v380_v13 }
  0xbd   : > { %921 = vmatpush3.bf16.msra.mxu0 %v920_v61  ;;  %502 = vmatprep.mubr.f32.mxu0 %v381_v19 }
  0xbe   : > { %923 = vmatprep.subr.bf16.mxu0 %v922_v63  ;;  %947 = vmatpush3.bf16.msra.mxu1 %v946_v5 }
  0xbf   : > { %948 = vmatprep.subr.bf16.mxu1 %v1340_v0 }
  0xc1   : > { %925 = vmatpush3.bf16.msra.mxu0 %v924_v11 }
  0xc2   : > { %927 = vmatprep.subr.bf16.mxu0 %v926_v14  ;;  %950 = vmatpush3.bf16.msra.mxu1 %v949_v18 }
  0xc3   : > { %951 = vmatprep.subr.bf16.mxu1 %v1340_v0 }
  0xc5   : > { %929 = vmatpush3.bf16.msra.mxu0 %v928_v22 }
  0xc6   : > { %953 = vmatpush3.bf16.msra.mxu1 %v952_v23 }
  0xc8   : > { %503 = vmatmul.mubr.f32.vlgmr.msra.gmra.mrb[0].mxu0 %v375_v12 }
  0xc9   : > { %896 = vmatmul.mubr.f32.vlgmr.msra.gmra.mrb[0].mxu1 %v365_v62 }
 0x19b   : > { %v843_v24 = vpop.f32.mrb[0].mxu0 }
 0x19c   : > { %v844_v25 = vpop.f32.mrb[1].mxu0  ;;  %v574_v28 = vpop.f32.mrb[0].mxu1 }
 0x19d   : > { %v845_v27 = vadd.f32 %v844_v25, %v843_v24  ;;  %v897_v29 = vpop.f32.mrb[1].mxu1 }
 0x19f   : > { %v505_v0 = vadd.f32 %v845_v27, %v804_v26 }
 0x1a1   : > { %v575_v30 = vadd.f32 %v574_v28, %v505_v0 }
 0x1a3   : > { %v583_v1 = vrot.slane %v575_v30, 4  ;;  %v589_v31 = vmul.f32 %v575_v30, %v575_v30  ;;  %578 = vst [vmem:[%s339_s8] sm:$0xff] %v575_v30 }
 0x1a4   : > { %1222 = shalt.err (!%p1219_p8)
}
 0x1a5   : > { %s1223_s9 = scalar_lea.hbm %s1641_s7, 128  ;;  %s1227_s8 = scalar_lea.hbm %s1728_s5, 256 }
 0x1a6   : > { %p1224_p9 = scmp.ne.s32.totalorder %s1641_s7, %s1223_s9  ;;  %p1228_p3 = scmp.lt.u32.totalorder %s1641_s7, %s1728_s5 }
 0x1a7   : > { %p1229_p1 = scmp.lt.u32.totalorder %s1227_s8, %s1223_s9  ;;  %p1231_p11 = scmp.lt.u32.totalorder %s1223_s9, %s1641_s7 }
 0x1a8   : > { %p1225_p4 = pnand %p1224_p9, %p1748_p0 }
 0x1a9   : > { %p1230_p12 = por %p1229_p1, %p1228_p3 }
 0x1aa   : > { %p1226_p6 = pneg %p1225_p4 }
 0x1ab   : > { %p1232_p5 = por %p1231_p11, %p1230_p12 }
 0x1ad   : > { %p1233_p7 = pnand %p1232_p5, %p1226_p6 }
 0x1af   : > { %1236 = shalt.err (!%p1233_p7)
}
 0x1b0   : > { %972 = dma.vmem_to_hbm [thread:$0]  (%p1748_p0), %s1643_s18, 128, %s1641_s7, %s602_s11   ;;  %v584_v32 = vadd.f32 %v583_v1, %v575_v30  ;;  %v590_v33 = vrot.slane %v589_v31, 4  ;;  %vm597_vm3 = vcmask 1040384   ;;  %v596_v43 = vld [vmem:[%s1631_s29] sm:$0x3] }
 0x1b1   : > { %s808_s27 = sshll.u32 %s1323_s24, 5  ;;  %s634_s13 = sshll.u32 %s1631_s29, 4  ;;  %s1675_s13 = int_to_ptr.vmem [resolvable:$true] %s634_s13 }
 0x1b2   : > { %v585_v34 = vrot.slane %v584_v32, 2  ;;  %v591_v35 = vadd.f32 %v590_v33, %v589_v31  ;;  %s1673_s11 = scalar_lea.hbm %s1729_s6, %s808_s27  ;;  %s607_s16 = scalar_lea.sflag [#allocation14], %s1599_s1 }
 0x1b3   : > { %s1237_s12 = scalar_lea.vmem %s1675_s13, 32  ;;  %s1344_s24 = smov [#allocation13]  }
 0x1b4   : > { %v586_v36 = vadd.f32 %v585_v34, %v584_v32  ;;  %v592_v37 = vrot.slane %v591_v35, 2  ;;  %p1238_p10 = scmp.ne.s32.totalorder %s1675_s13, %s1237_s12  ;;  %s1241_s9 = sshll.u32 %s1344_s24, 4  ;;  %s1242_s9 = int_to_ptr.vmem [resolvable:$false] %s1241_s9 }
 0x1b5   : > { %s1243_s28 = scalar_lea.vmem %s1242_s9, 64  ;;  %p1244_p8 = scmp.lt.s32.totalorder %s1675_s13, %s1242_s9 }
 0x1b6   : > { %v587_v38 = vrot.slane %v586_v36, 1  ;;  %v593_v39 = vadd.f32 %v592_v37, %v591_v35  ;;  %p1239_p13 = pnand %p1238_p10, %p1748_p0  ;;  %p1245_p9 = scmp.lt.s32.totalorder %s1243_s28, %s1237_s12 }
 0x1b8   : > { %v594_v40 = vrot.slane %v593_v39, 1  ;;  %v588_v41 = vadd.f32 %v587_v38, %v586_v36  ;;  %p1240_p2 = pneg %p1239_p13  ;;  %p1246_p4 = por %p1245_p9, %p1244_p8 }
 0x1ba   : > { %v595_v42 = vadd.f32 %v594_v40, %v593_v39  ;;  %p1247_p6 = pnand %p1246_p4, %p1240_p2 }
 0x1bc   : > { %v598_v44 = vsel %vm597_vm3, %v588_v41, %v595_v42 }
 0x1bd   : > { %v599_v45 = vadd.f32 %v598_v44, %v596_v43 }
 0x1bf   : > { %600 = vst [vmem:[%s1631_s29] sm:$0x3] %v599_v45 }
 0x1c0   : > { %1250 = shalt.err (!%p1247_p6)
}
 0x1c1   : > { %s1251_s1 = scalar_lea.hbm %s1673_s11, 32  ;;  %s1255_s8 = scalar_lea.hbm %s1729_s6, 64 }
 0x1c2   : > { %p1252_p3 = scmp.ne.s32.totalorder %s1673_s11, %s1251_s1  ;;  %p1256_p11 = scmp.lt.u32.totalorder %s1673_s11, %s1729_s6 }
 0x1c3   : > { %p1257_p5 = scmp.lt.u32.totalorder %s1255_s8, %s1251_s1  ;;  %p1259_p10 = scmp.lt.u32.totalorder %s1251_s1, %s1673_s11 }
 0x1c4   : > { %p1253_p1 = pnand %p1252_p3, %p1748_p0 }
 0x1c5   : > { %p1258_p7 = por %p1257_p5, %p1256_p11 }
 0x1c6   : > { %p1254_p12 = pneg %p1253_p1 }
 0x1c7   : > { %p1260_p13 = por %p1259_p10, %p1258_p7 }
 0x1c9   : > { %p1261_p2 = pnand %p1260_p13, %p1254_p12 }
 0x1cb   : > { %1264 = shalt.err (!%p1261_p2)
}
 0x1cc   : > { %973 = dma.vmem_to_hbm [thread:$0]  (%p1748_p0), %s1675_s13, 32, %s1673_s11, %s607_s16  }
 0x1cd PF: > { %s646_s27 = sand.u32 1, %s1311_s21   ;;  %p1749_p8 = scmp.ne.s32.totalorder %s1744_s30, 0 }
 0x1ce   : > { %p1750_p9 = scmp.ge.s32.totalorder %s1331_s26, 2  ;;  %s647_s18 = scalar_lea.sflag [#allocation5], %s646_s27 }
 0x1d0   : > { %p994_p4 = pnand %p1750_p9, %p1749_p8 }
 0x1d2   : > { %1302 = dma.done.wait (!%p994_p4), %s647_s18, 128  }
 0x1d3   : > { %1304 = vsyncadd (!%p994_p4), %s647_s18, 4294967168  ;;  %s656_s7 = scalar_lea.sflag [#allocation14], %s646_s27 }
 0x1d4   : > { %1306 = dma.done.wait (!%p994_p4), %s656_s7, 32  }
 0x1d5   : > { %1308 = vsyncadd (!%p994_p4), %s656_s7, 4294967264  ;;  %s28_s26 = sadd.s32 1, %s1331_s26   ;;  %s1751_s21 = smov %s1315_s22 }
 0x1d6   : > { %p25_p6 = scmp.ge.s32.totalorder %s28_s26, 4   ;;  %s1752_s22 = smov %s1319_s23 }
 0x1d7   : > { %s1753_s23 = smov %s1549_s20  ;;  %s1754_s24 = smov %s1327_s25 }
 0x1d8   : > { %s1755_s25 = smov %s1757_s14  ;;  %27 = sbr.rel (!%p25_p6) target bundleno = 12 (0xc), region = 126 }
 0x1df   :  { %661 = vsyncpa [#allocation4], 1 }
 0x1e0   :  { %663 = vsyncpa [#allocation4 + $0x1], 1 }
 0x1e1   :  { %664 = vsyncpa [#allocation7], 1 }
 0x1e2   :  { %665 = vsyncpa [#allocation10], 1 }
 0x1e3   :  { %666 = vsyncpa [#allocation5], 1 }
 0x1e4   :  { %668 = vsyncpa [#allocation5 + $0x1], 1 }
 0x1e5   :  { %669 = vsyncpa [#allocation14], 1 }
 0x1e6   :  { %671 = vsyncpa [#allocation14 + $0x1], 1 }

</bundles_post_ra>
